<compile_context>
chip_gen: v6e
topology: v6e:2x2x1
jax: 0.10.0
libtpu: 0.0.40
codegen_flags: <defaults>
</compile_context>

<pallas_src>
import jax
import jax.numpy as jnp
from jax.experimental import pallas as pl
from jax.experimental.pallas import tpu as pltpu


def _round_up(n, m):
    return ((n + m - 1) // m) * m


def _make_kernel(sin_bf16):
    act_dtype = jnp.bfloat16 if sin_bf16 else jnp.float32
    prec = jax.lax.Precision.HIGHEST

    def _sin(z):
        # bf16 sin halves the VALU cost of the binding activation on v6e/v7x;
        # f32 (default) keeps exact reference semantics.
        return jnp.sin(z.astype(act_dtype)).astype(jnp.float32)

    def kernel(x_ref,
               w1_ref, b1_ref,
               w2_ref, b2_ref,
               w3_ref, b3_ref,
               w4_ref, b4_ref,
               o_ref):
        # Layer 1: (H, 2) @ (2, TN) + (H, 1) -> sin    (lane axis = batch)
        h = _sin(jnp.dot(w1_ref[...], x_ref[...],
                         preferred_element_type=jnp.float32,
                         precision=prec) + b1_ref[...])
        # Layer 2: (H, H) @ (H, TN) + (H, 1) -> sin
        h = _sin(jnp.dot(w2_ref[...], h,
                         preferred_element_type=jnp.float32,
                         precision=prec) + b2_ref[...])
        # Layer 3: (H, H) @ (H, TN) + (H, 1) -> sin
        h = _sin(jnp.dot(w3_ref[...], h,
                         preferred_element_type=jnp.float32,
                         precision=prec) + b3_ref[...])
        # Output layer, padded to M=8 rows for the MXU: (8, H) @ (H, TN) + (8, 1)
        y = jnp.dot(w4_ref[...], h,
                    preferred_element_type=jnp.float32,
                    precision=prec) + b4_ref[...]
        # Lane-dense (1, TN) store of the real (row-0) output.
        o_ref[...] = y[0:1, :]

    return kernel


def _choose_tile(n, tile_n):
    """Lane-tile size: multiple of 128, capped at tile_n, and split so that
    whenever possible there are >=2 grid steps (v7x megacore sharding)."""
    n_unit = _round_up(n, 128)
    if n_unit >= 256:
        half = _round_up(-(-n_unit // 2), 128)
        return max(128, min(tile_n, half))
    return n_unit  # 128: too small to split


def simple_model_forward(x, params, *, tile_n=16384, sin_bf16=False):
    """x: (N, 2) float32 -> (N, 1) float32.

    params = (w1, b1, w2, b2, w3, b3, w4, b4) with
      wK: (out_features, in_features)   (PyTorch nn.Linear.weight layout)
      bK: (out_features, 1)
    """
    (w1, b1, w2, b2, w3, b3, w4, b4) = params
    n = x.shape[0]
    h_dim = w1.shape[0]

    tn = _choose_tile(n, tile_n)
    n_pad = _round_up(n, tn)

    # Single pad+transpose pass (no zeros + dynamic-update-slice): (N,2)->(2,N_pad).
    x_t = jnp.pad(x.astype(jnp.float32).T, ((0, 0), (0, n_pad - n)))

    # Zero-pad the (1, H)/(1, 1) output layer to 8 rows -> MXU-friendly M dim.
    w4p = jnp.pad(w4, ((0, 8 - w4.shape[0]), (0, 0)))
    b4p = jnp.pad(b4, ((0, 8 - b4.shape[0]), (0, 0)))

    # Parameters: full-array blocks, constant block index -> fetched once,
    # VMEM-resident across all grid steps (they total < 4 KiB).
    param_spec = lambda a: pl.BlockSpec(a.shape, lambda i: (0, 0))

    out_t = pl.pallas_call(
        _make_kernel(sin_bf16),
        out_shape=jax.ShapeDtypeStruct((1, n_pad), jnp.float32),
        grid=(n_pad // tn,),
        in_specs=[pl.BlockSpec((2, tn), lambda i: (0, i)),
                  param_spec(w1), param_spec(b1),
                  param_spec(w2), param_spec(b2),
                  param_spec(w3), param_spec(b3),
                  param_spec(w4p), param_spec(b4p)],
        out_specs=pl.BlockSpec((1, tn), lambda i: (0, i)),
        compiler_params=pltpu.CompilerParams(
            dimension_semantics=("parallel",)),
    )(x_t, w1, b1, w2, b2, w3, b3, w4p, b4p)

    # (1, N_pad) -> (N, 1)   (transpose of a (1, N) slab is a free reshape)
    return out_t[:, :n].T


def init_params(key, hidden_size=16):
    """Deterministic init mimicking nn.Linear's U(-1/sqrt(fan_in), 1/sqrt(fan_in)).

    Weights are (out, in); biases are (out, 1)."""
    dims = [(2, hidden_size),
            (hidden_size, hidden_size),
            (hidden_size, hidden_size),
            (hidden_size, 1)]
    params = []
    for (fan_in, fan_out) in dims:
        key, kw, kb = jax.random.split(key, 3)
        bound = 1.0 / jnp.sqrt(float(fan_in))
        w = jax.random.uniform(kw, (fan_out, fan_in), jnp.float32,
                               minval=-bound, maxval=bound)
        b = jax.random.uniform(kb, (fan_out, 1), jnp.float32,
                               minval=-bound, maxval=bound)
        params.extend([w, b])
    return tuple(params)


def _reference_forward(x, params):
    """Plain-JAX reference (y = x @ W.T + b, matching nn.Linear)."""
    (w1, b1, w2, b2, w3, b3, w4, b4) = params
    h = jnp.sin(x @ w1.T + b1.T)
    h = jnp.sin(h @ w2.T + b2.T)
    h = jnp.sin(h @ w3.T + b3.T)
    return h @ w4.T + b4.T


if __name__ == "__main__":
    key = jax.random.PRNGKey(0)
    k_params, k_x1, k_x2 = jax.random.split(key, 3)

    hidden_size = 16
    params = init_params(k_params, hidden_size)

    # Small batch: single 128-lane tile.
    x_small = jax.random.uniform(k_x1, (8, 2), jnp.float32)
    out_small = jax.block_until_ready(simple_model_forward(x_small, params))
    ref_small = _reference_forward(x_small, params)
    assert out_small.shape == (8, 1)
    assert jnp.allclose(out_small, ref_small, atol=1e-5, rtol=1e-5)

    # Medium batch: exercises padding + the >=2-grid-step (two-TensorCore) path.
    x_med = jax.random.uniform(k_x2, (300, 2), jnp.float32)
    out_med = jax.block_until_ready(simple_model_forward(x_med, params))
    ref_med = _reference_forward(x_med, params)
    assert out_med.shape == (300, 1)
    assert jnp.allclose(out_med, ref_med, atol=1e-5, rtol=1e-5)

    print("KERNEL_OK")
</pallas_src>

<mosaic_0001>
module attributes {stable_mosaic.version = 11 : i64} {
  func.func @kernel(%arg0: i32, %arg1: memref<2x128xf32, #tpu.memory_space<vmem>>, %arg2: memref<16x2xf32, #tpu.memory_space<vmem>>, %arg3: memref<16x1xf32, #tpu.memory_space<vmem>>, %arg4: memref<16x16xf32, #tpu.memory_space<vmem>>, %arg5: memref<16x1xf32, #tpu.memory_space<vmem>>, %arg6: memref<16x16xf32, #tpu.memory_space<vmem>>, %arg7: memref<16x1xf32, #tpu.memory_space<vmem>>, %arg8: memref<8x16xf32, #tpu.memory_space<vmem>>, %arg9: memref<8x1xf32, #tpu.memory_space<vmem>>, %arg10: memref<1x128xf32, #tpu.memory_space<vmem>>) attributes {dimension_semantics = [#tpu.dimension_semantics<parallel>], iteration_bounds = array<i64: 1>, scalar_prefetch = 0 : i64, scratch_operands = 0 : i64, tpu.core_type = #tpu.core_type<tc>, window_params = [{transform_indices = @transform_0, window_bounds = array<i64: 2, 128>}, {pipeline_mode = #tpu.pipeline_mode<synchronous>, transform_indices = @transform_1, window_bounds = array<i64: 16, 2>}, {pipeline_mode = #tpu.pipeline_mode<synchronous>, transform_indices = @transform_2, window_bounds = array<i64: 16, 1>}, {pipeline_mode = #tpu.pipeline_mode<synchronous>, transform_indices = @transform_3, window_bounds = array<i64: 16, 16>}, {pipeline_mode = #tpu.pipeline_mode<synchronous>, transform_indices = @transform_4, window_bounds = array<i64: 16, 1>}, {pipeline_mode = #tpu.pipeline_mode<synchronous>, transform_indices = @transform_5, window_bounds = array<i64: 16, 16>}, {pipeline_mode = #tpu.pipeline_mode<synchronous>, transform_indices = @transform_6, window_bounds = array<i64: 16, 1>}, {pipeline_mode = #tpu.pipeline_mode<synchronous>, transform_indices = @transform_7, window_bounds = array<i64: 8, 16>}, {pipeline_mode = #tpu.pipeline_mode<synchronous>, transform_indices = @transform_8, window_bounds = array<i64: 8, 1>}, {transform_indices = @transform_9, window_bounds = array<i64: 1, 128>}]} {
    %c0 = arith.constant 0 : index
    %c0_0 = arith.constant 0 : index
    %0 = vector.load %arg2[%c0, %c0_0] : memref<16x2xf32, #tpu.memory_space<vmem>>, vector<16x2xf32>
    %c0_1 = arith.constant 0 : index
    %c0_2 = arith.constant 0 : index
    %1 = vector.load %arg1[%c0_1, %c0_2] : memref<2x128xf32, #tpu.memory_space<vmem>>, vector<2x128xf32>
    %cst = arith.constant dense<0.000000e+00> : vector<16x128xf32>
    %2 = tpu.matmul %0, %1, %cst {dimension_numbers = #tpu.dot_dimension_numbers<[1], [0], [0], [1], [0, 0, 1, 1], [], []>, precision = #tpu.contract_precision<fp32>} : vector<16x2xf32>, vector<2x128xf32>, vector<16x128xf32> -> vector<16x128xf32>
    %c0_3 = arith.constant 0 : index
    %c0_4 = arith.constant 0 : index
    %3 = vector.load %arg3[%c0_3, %c0_4] : memref<16x1xf32, #tpu.memory_space<vmem>>, vector<16x1xf32>
    %4 = vector.broadcast %3 : vector<16x1xf32> to vector<16x128xf32>
    %5 = arith.addf %2, %4 : vector<16x128xf32>
    %6 = math.sin %5 : vector<16x128xf32>
    %c0_5 = arith.constant 0 : index
    %c0_6 = arith.constant 0 : index
    %7 = vector.load %arg4[%c0_5, %c0_6] : memref<16x16xf32, #tpu.memory_space<vmem>>, vector<16x16xf32>
    %cst_7 = arith.constant dense<0.000000e+00> : vector<16x128xf32>
    %8 = tpu.matmul %7, %6, %cst_7 {dimension_numbers = #tpu.dot_dimension_numbers<[1], [0], [0], [1], [0, 0, 1, 1], [], []>, precision = #tpu.contract_precision<fp32>} : vector<16x16xf32>, vector<16x128xf32>, vector<16x128xf32> -> vector<16x128xf32>
    %c0_8 = arith.constant 0 : index
    %c0_9 = arith.constant 0 : index
    %9 = vector.load %arg5[%c0_8, %c0_9] : memref<16x1xf32, #tpu.memory_space<vmem>>, vector<16x1xf32>
    %10 = vector.broadcast %9 : vector<16x1xf32> to vector<16x128xf32>
    %11 = arith.addf %8, %10 : vector<16x128xf32>
    %12 = math.sin %11 : vector<16x128xf32>
    %c0_10 = arith.constant 0 : index
    %c0_11 = arith.constant 0 : index
    %13 = vector.load %arg6[%c0_10, %c0_11] : memref<16x16xf32, #tpu.memory_space<vmem>>, vector<16x16xf32>
    %cst_12 = arith.constant dense<0.000000e+00> : vector<16x128xf32>
    %14 = tpu.matmul %13, %12, %cst_12 {dimension_numbers = #tpu.dot_dimension_numbers<[1], [0], [0], [1], [0, 0, 1, 1], [], []>, precision = #tpu.contract_precision<fp32>} : vector<16x16xf32>, vector<16x128xf32>, vector<16x128xf32> -> vector<16x128xf32>
    %c0_13 = arith.constant 0 : index
    %c0_14 = arith.constant 0 : index
    %15 = vector.load %arg7[%c0_13, %c0_14] : memref<16x1xf32, #tpu.memory_space<vmem>>, vector<16x1xf32>
    %16 = vector.broadcast %15 : vector<16x1xf32> to vector<16x128xf32>
    %17 = arith.addf %14, %16 : vector<16x128xf32>
    %18 = math.sin %17 : vector<16x128xf32>
    %c0_15 = arith.constant 0 : index
    %c0_16 = arith.constant 0 : index
    %19 = vector.load %arg8[%c0_15, %c0_16] : memref<8x16xf32, #tpu.memory_space<vmem>>, vector<8x16xf32>
    %cst_17 = arith.constant dense<0.000000e+00> : vector<8x128xf32>
    %20 = tpu.matmul %19, %18, %cst_17 {dimension_numbers = #tpu.dot_dimension_numbers<[1], [0], [0], [1], [0, 0, 1, 1], [], []>, precision = #tpu.contract_precision<fp32>} : vector<8x16xf32>, vector<16x128xf32>, vector<8x128xf32> -> vector<8x128xf32>
    %c0_18 = arith.constant 0 : index
    %c0_19 = arith.constant 0 : index
    %21 = vector.load %arg9[%c0_18, %c0_19] : memref<8x1xf32, #tpu.memory_space<vmem>>, vector<8x1xf32>
    %22 = vector.broadcast %21 : vector<8x1xf32> to vector<8x128xf32>
    %23 = arith.addf %20, %22 : vector<8x128xf32>
    %24 = vector.extract_strided_slice %23 {offsets = [0, 0], sizes = [1, 128], strides = [1, 1]} : vector<8x128xf32> to vector<1x128xf32>
    %c0_20 = arith.constant 0 : index
    %c0_21 = arith.constant 0 : index
    %25 = vector.load %arg10[%c0_20, %c0_21] : memref<1x128xf32, #tpu.memory_space<vmem>>, vector<1x128xf32>
    tpu.vector_store %arg10[%c0_20, %c0_21], %24 {strides = array<i32>} : memref<1x128xf32, #tpu.memory_space<vmem>>, vector<1x128xf32>,
    return
  }
  func.func @transform_0(%arg0: i32) -> (i32, i32) {
    %c0_i32 = arith.constant 0 : i32
    %c0_i32_0 = arith.constant 0 : i32
    return %c0_i32, %arg0 : i32, i32
  }
  func.func @transform_1(%arg0: i32) -> (i32, i32) {
    %c0_i32 = arith.constant 0 : i32
    %c0_i32_0 = arith.constant 0 : i32
    %c0_i32_1 = arith.constant 0 : i32
    return %c0_i32, %c0_i32_0 : i32, i32
  }
  func.func @transform_2(%arg0: i32) -> (i32, i32) {
    %c0_i32 = arith.constant 0 : i32
    %c0_i32_0 = arith.constant 0 : i32
    %c0_i32_1 = arith.constant 0 : i32
    return %c0_i32, %c0_i32_0 : i32, i32
  }
  func.func @transform_3(%arg0: i32) -> (i32, i32) {
    %c0_i32 = arith.constant 0 : i32
    %c0_i32_0 = arith.constant 0 : i32
    %c0_i32_1 = arith.constant 0 : i32
    return %c0_i32, %c0_i32_0 : i32, i32
  }
  func.func @transform_4(%arg0: i32) -> (i32, i32) {
    %c0_i32 = arith.constant 0 : i32
    %c0_i32_0 = arith.constant 0 : i32
    %c0_i32_1 = arith.constant 0 : i32
    return %c0_i32, %c0_i32_0 : i32, i32
  }
  func.func @transform_5(%arg0: i32) -> (i32, i32) {
    %c0_i32 = arith.constant 0 : i32
    %c0_i32_0 = arith.constant 0 : i32
    %c0_i32_1 = arith.constant 0 : i32
    return %c0_i32, %c0_i32_0 : i32, i32
  }
  func.func @transform_6(%arg0: i32) -> (i32, i32) {
    %c0_i32 = arith.constant 0 : i32
    %c0_i32_0 = arith.constant 0 : i32
    %c0_i32_1 = arith.constant 0 : i32
    return %c0_i32, %c0_i32_0 : i32, i32
  }
  func.func @transform_7(%arg0: i32) -> (i32, i32) {
    %c0_i32 = arith.constant 0 : i32
    %c0_i32_0 = arith.constant 0 : i32
    %c0_i32_1 = arith.constant 0 : i32
    return %c0_i32, %c0_i32_0 : i32, i32
  }
  func.func @transform_8(%arg0: i32) -> (i32, i32) {
    %c0_i32 = arith.constant 0 : i32
    %c0_i32_0 = arith.constant 0 : i32
    %c0_i32_1 = arith.constant 0 : i32
    return %c0_i32, %c0_i32_0 : i32, i32
  }
  func.func @transform_9(%arg0: i32) -> (i32, i32) {
    %c0_i32 = arith.constant 0 : i32
    %c0_i32_0 = arith.constant 0 : i32
    return %c0_i32, %arg0 : i32, i32
  }
}

</mosaic_0001>

<bundles_post_ra>
// kernel: tpu_custom_call.1
= control target key start
LH: loop header
LB: loop body
LE: loop exit
PB: predicated region body
PF: predicated region fallthrough
CT: control target
= control target key end

     0   :  { %vm55_vm0 = vcmask 1041408   ;;  %vm48_vm1 = vcmask 15360   ;;  %v3047_v10 = vmov 0   ;;  %s3493_s0 = inlined_call_operand.vmem [shape: f32[2,128], index: 0, kind: input, shape index: {}]   ;;  %s3494_s1 = inlined_call_operand.vmem [shape: f32[16,2], index: 1, kind: input, shape index: {}]   ;;  %s3495_s2 = inlined_call_operand.vmem [shape: f32[16,1], index: 2, kind: input, shape index: {}]   ;;  %s3496_s3 = inlined_call_operand.vmem [shape: f32[16,16], index: 3, kind: input, shape index: {}]   ;;  %s3497_s4 = inlined_call_operand.vmem [shape: f32[16,1], index: 4, kind: input, shape index: {}]   ;;  %s3498_s5 = inlined_call_operand.vmem [shape: f32[16,16], index: 5, kind: input, shape index: {}]   ;;  %s3499_s6 = inlined_call_operand.vmem [shape: f32[16,1], index: 6, kind: input, shape index: {}]   ;;  %s3500_s7 = inlined_call_operand.vmem [shape: f32[8,16], index: 7, kind: input, shape index: {}]   ;;  %s3501_s8 = inlined_call_operand.vmem [shape: f32[8,1], index: 8, kind: input, shape index: {}]   ;;  %s3502_s9 = inlined_call_operand.hbm [shape: f32[1,128], index: 9, kind: output, shape index: {}]  }
   0x1   :  { %v35_v0 = vld [vmem:[%s3493_s0] sm:$0x3]  ;;  %v34_v2 = vld [vmem:[%s3494_s1 + $0x8] sm:$0xff]  ;;  %2999 = vset.pattern.permute.xlu0 %v3047_v10  ;;  %3000 = vset.pattern.permute.xlu1 %v3047_v10 }
   0x2   :  { %v33_v1 = vld [vmem:[%s3494_s1] sm:$0xff]  ;;  %v57_v3 = vsel %vm55_vm0, %v35_v0, 0  ;;  %v53_v5 = vsel %vm48_vm1, %v34_v2, 0  ;;  %v37_v6 = vld [vmem:[%s3495_s2 + $0x8] sm:$0xff] }
   0x3   :  { %v50_v4 = vsel %vm48_vm1, %v33_v1, 0  ;;  %v90_v7 = vand.u32 4294901760, %v57_v3  ;;  %v135_v9 = vand.u32 4294901760, %v53_v5  ;;  %45 = vperm.xlu0 %2999, %v37_v6  }
   0x4   :  { %v125_v8 = vand.u32 4294901760, %v50_v4 }
   0x5   :  { %14 = vsyncpa [#allocation3], 0  ;;  %2809 = vmatprep.subr.mxu0 %v90_v7  ;;  %v177_v12 = vsub.f32 %v57_v3, %v90_v7  ;;  %v136_v13 = vsub.f32 %v53_v5, %v135_v9  ;;  %v36_v14 = vld [vmem:[%s3495_s2] sm:$0xff]  ;;  %v1490_v21 = vld [vmem:[%s3499_s6 + $0x8] sm:$0xff]  ;;  %vm770_vm2 = vcmask 130048  }
   0x6   :  { %v126_v11 = vsub.f32 %v50_v4, %v125_v8  ;;  %2816 = vmatprep.mubr.f32.mxu1 %v125_v8  ;;  %2810 = vmatpush3.msra.mxu0 %v90_v7  ;;  %v2218_v25 = vld [vmem:[%s3501_s8] sm:$0xff]  ;;  %v759_v37 = vld [vmem:[%s3497_s4 + $0x8] sm:$0xff] }
   0x7   :  { %v178_v16 = vand.u32 4294901760, %v177_v12  ;;  %v137_v17 = vand.u32 4294901760, %v136_v13  ;;  %2819 = vmatprep.subr.mxu0 %v177_v12  ;;  %40 = vperm.xlu0 %2999, %v36_v14   ;;  %v756_v26 = vld [vmem:[%s3496_s3] sm:$0xff] }
   0x8   :  { %v127_v15 = vand.u32 4294901760, %v126_v11  ;;  %v772_v27 = vsel %vm770_vm2, %v756_v26, 0  ;;  %767 = vperm.xlu1 %3000, %v759_v37   ;;  %v758_v43 = vld [vmem:[%s3497_s4] sm:$0xff] }
   0x9   :  { %v179_v19 = vsub.f32 %v177_v12, %v178_v16  ;;  %v138_v20 = vsub.f32 %v136_v13, %v137_v17  ;;  %v3132_v28 = vand.u32 4294901760, %v772_v27  ;;  %v1489_v52 = vld [vmem:[%s3499_s6] sm:$0xff] }
   0xa   :  { %v128_v18 = vsub.f32 %v126_v11, %v127_v15 }
   0xb   :  { %v180_v23 = vand.u32 4294901760, %v179_v19  ;;  %v139_v24 = vand.u32 4294901760, %v138_v20  ;;  %1498 = vperm.xlu0 %2999, %v1490_v21   ;;  %v3135_v29 = vsub.f32 %v772_v27, %v3132_v28  ;;  %v3049_v19 = vmov 2475754826  }
   0xc   :  { %v129_v22 = vand.u32 4294901760, %v128_v18  ;;  %762 = vperm.xlu1 %3000, %v758_v43   ;;  %v3050_v21 = vmov 2131351028  }
   0xd   :  { %2814 = vmatprep.subr.mxu1 %v180_v23  ;;  %v846_v30 = vand.u32 4294901760, %v3135_v29 }
   0xe   :  { %2811 = vmatprep.mubr.f32.mxu0 %v129_v22  ;;  %2815 = vmatpush3.msra.mxu1 %v180_v23  ;;  %v3051_v23 = vmov 2102212464  }
   0xf   :  { %2812 = vmatmul.mubr.f32.vlgmr.msra.gmra.mxu0 %v139_v24  ;;  %2817 = vmatmul.mubr.f32.vlgmr.msra.gmra.mxu1 %v135_v9  ;;  %v847_v31 = vsub.f32 %v3135_v29, %v846_v30 }
  0x10   :  { %2820 = vmatpush3.msra.mxu0 %v177_v12  ;;  %2824 = vmatprep.subr.mxu1 %v90_v7 }
  0x11   :  { %2821 = vmatprep.mubr.f32.mxu0 %v126_v11  ;;  %2825 = vmatpush3.msra.mxu1 %v90_v7  ;;  %v848_v32 = vand.u32 4294901760, %v847_v31 }
  0x12   :  { %2826 = vmatprep.mubr.f32.mxu1 %v127_v15  ;;  %2829 = vmatprep.subr.mxu0 %v178_v16 }
  0x13   :  { %2822 = vmatmul.mubr.f32.vlgmr.msra.gmra.mxu0 %v136_v13  ;;  %2827 = vmatmul.mubr.f32.vlgmr.msra.gmra.mxu1 %v137_v17 }
  0x14   :  { %2830 = vmatpush3.msra.mxu0 %v178_v16  ;;  %2834 = vmatprep.subr.mxu1 %v90_v7  ;;  %v3048_v16 = vmov 683565275  }
  0x15   :  { %2831 = vmatprep.mubr.f32.mxu0 %v125_v8  ;;  %2835 = vmatpush3.msra.mxu1 %v90_v7 }
  0x16   :  { %2836 = vmatprep.mubr.f32.mxu1 %v125_v8  ;;  %2221 = vperm.xlu0 %2999, %v2218_v25   ;;  %v3052_v25 = vmov 920167782  }
  0x17   :  { %2832 = vmatmul.mubr.f32.vlgmr.msra.gmra.mxu0 %v135_v9  ;;  %2837 = vmatmul.mubr.f32.vlgmr.msra.gmra.mxu1 %v135_v9 }
  0x18   :  { %2850 = vmatprep.mubr.f32.mxu1 %v3132_v28  ;;  %2843 = vmatprep.mubr.f32.mxu0 %v848_v32 }
  0x19   :  { %1493 = vperm.xlu1 %3000, %v1489_v52  }
  0x7e   :  { %v46_v33 = vpop.permute.xlu0 %45 }
  0x82   :  { %v41_v38 = vpop.permute.xlu0 %40 }
  0xcf   :  { %v2813_v34 = vpop.f32.mrf.mxu0  ;;  %v2818_v36 = vpop.f32.mrf.mxu1 }
  0xd0   :  { %v142_v35 = vadd.f32 %v2813_v34, %v46_v33 }
  0xd1   :  { %v131_v39 = vpop.f32.mrf.mxu0  ;;  %v217_v42 = vpop.f32.mrf.mxu1 }
  0xd2   :  { %v224_v40 = vadd.f32 %v2818_v36, %v142_v35  ;;  %v132_v41 = vadd.f32 %v131_v39, %v41_v38  ;;  %v3053_v35 = vmov 1326507024  }
  0xd3   :  { %v2823_v44 = vpop.f32.mrf.mxu0  ;;  %v2828_v47 = vpop.f32.mrf.mxu1 }
  0xd4   :  { %v218_v45 = vadd.f32 %v217_v42, %v132_v41  ;;  %v305_v46 = vadd.f32 %v2823_v44, %v224_v40 }
  0xd5   :  { %v297_v48 = vpop.f32.mrf.mxu0  ;;  %v378_v51 = vpop.f32.mrf.mxu1 }
  0xd6   :  { %v387_v49 = vadd.f32 %v2828_v47, %v305_v46  ;;  %v298_v50 = vadd.f32 %v297_v48, %v218_v45 }
  0xd7   :  { %v2833_v53 = vpop.f32.mrf.mxu0  ;;  %v2838_v56 = vpop.f32.mrf.mxu1 }
  0xd8   :  { %v379_v54 = vadd.f32 %v378_v51, %v298_v50  ;;  %v467_v55 = vadd.f32 %v2833_v53, %v387_v49 }
  0xd9   :  { %v460_v57 = vpop.f32.mrf.mxu0  ;;  %v538_v60 = vpop.f32.mrf.mxu1 }
  0xda   :  { %v3151_v58 = vadd.f32 %v2838_v56, %v467_v55  ;;  %v461_v59 = vadd.f32 %v460_v57, %v379_v54 }
  0xdc   :  { %v652_v61 = vand.u32 2147483647, %v3151_v58  ;;  %v655_v62 = vand.u32 2139095040, %v3151_v58  ;;  %v3155_v63 = vadd.f32 %v538_v60, %v461_v59  ;;  %vm654_vm1 = vcmp.lt.s32.totalorder %v3151_v58, 0 }
  0xde   :  { %v656_v0 = vshrl.u32 %v655_v62, 23  ;;  %v659_v1 = vand.u32 8388607, %v652_v61  ;;  %v551_v2 = vand.u32 2139095040, %v3155_v63  ;;  %v548_v4 = vand.u32 2147483647, %v3155_v63 }
  0xe0   :  { %v2705_v3 = vadd.s32 4294967169, %v656_v0  ;;  %v552_v5 = vshrl.u32 %v551_v2, 23  ;;  %v660_v7 = vor.u32 8388608, %v659_v1  ;;  %v555_v9 = vand.u32 8388607, %v548_v4 }
  0xe2   :  { %v662_v6 = vadd.s32 1, %v2705_v3  ;;  %v2701_v8 = vadd.s32 4294967169, %v552_v5  ;;  %v3163_v14 = vshll.u32 %v660_v7, 8  ;;  %v556_v18 = vor.u32 8388608, %v555_v9 }
  0xe4   :  { %vm663_vm3 = vcmp.gt.s32.totalorder %v662_v6, 0  ;;  %v558_v11 = vadd.s32 1, %v2701_v8  ;;  %v596_v54 = vshll.u32 %v556_v18, 8 }
  0xe5   :  { %v664_v10 = vsel %vm663_vm3, %v662_v6, 0  ;;  %vm653_vm3 = vcmp.le.f32.partialorder %v652_v61, 0.7853982 }
  0xe6   :  { %v665_v12 = vshrl.u32 %v664_v10, 5  ;;  %v666_v13 = vand.u32 31, %v664_v10  ;;  %vm559_vm4 = vcmp.gt.s32.totalorder %v558_v11, 0 }
  0xe7   :  { %v560_v40 = vsel %vm559_vm4, %v558_v11, 0  ;;  %vm550_vm4 = vcmp.lt.s32.totalorder %v3155_v63, 0 }
  0xe8   :  { %v667_v15 = vsub.s32 32, %v666_v13  ;;  %v669_v17 = vshll.u32 %v3048_v16, %v666_v13  ;;  %v672_v20 = vshll.u32 %v3049_v19, %v666_v13  ;;  %v675_v22 = vshll.u32 %v3050_v21, %v666_v13 }
  0xe9   :  { %v678_v24 = vshll.u32 %v3051_v23, %v666_v13  ;;  %v681_v26 = vshll.u32 %v3052_v25, %v666_v13  ;;  %vm684_vm5 = vcmp.lt.s32.totalorder %v665_v12, 1  ;;  %vm686_vm6 = vcmp.lt.s32.totalorder %v665_v12, 3 }
  0xea   :  { %v670_v27 = vshrl.u32 %v3049_v19, %v667_v15  ;;  %v673_v31 = vshrl.u32 %v3050_v21, %v667_v15  ;;  %v676_v32 = vshrl.u32 %v3051_v23, %v667_v15  ;;  %v668_v33 = vshrl.u32 %v3048_v16, %v667_v15 }
  0xeb   :  { %v679_v34 = vshrl.u32 %v3052_v25, %v667_v15  ;;  %v682_v36 = vshrl.u32 %v3053_v35, %v667_v15  ;;  %vm687_vm7 = vcmp.lt.s32.totalorder %v665_v12, 4  ;;  %v562_v43 = vand.u32 31, %v560_v40 }
  0xec   :  { %v671_v37 = vor.u32 %v670_v27, %v669_v17  ;;  %v674_v38 = vor.u32 %v673_v31, %v672_v20  ;;  %v677_v39 = vor.u32 %v676_v32, %v675_v22  ;;  %vm685_vm8 = vcmp.lt.s32.totalorder %v665_v12, 2 }
  0xed   :  { %v680_v41 = vor.u32 %v679_v34, %v678_v24  ;;  %v683_v42 = vor.u32 %v682_v36, %v681_v26  ;;  %v563_v51 = vsub.s32 32, %v562_v43  ;;  %v561_v59 = vshrl.u32 %v560_v40, 5 }
  0xee   :  { %v688_v44 = vsel %vm684_vm5, %v668_v33, %v671_v37  ;;  %v689_v45 = vsel %vm687_vm7, %v677_v39, 2102212464  ;;  %v692_v46 = vsel %vm684_vm5, %v671_v37, %v674_v38  ;;  %v696_v47 = vsel %vm684_vm5, %v674_v38, %v677_v39 }
  0xef   :  { %v690_v48 = vsel %vm686_vm6, %v674_v38, %v689_v45  ;;  %v693_v49 = vsel %vm687_vm7, %v680_v41, 920167782  ;;  %v697_v50 = vsel %vm687_vm7, %v683_v42, 1326507024  ;;  %v565_v2 = vshll.u32 %v3048_v16, %v562_v43 }
  0xf0   :  { %v694_v52 = vsel %vm686_vm6, %v677_v39, %v693_v49  ;;  %v698_v53 = vsel %vm686_vm6, %v680_v41, %v697_v50  ;;  %v691_v55 = vsel %vm685_vm8, %v688_v44, %v690_v48  ;;  %v566_v3 = vshrl.u32 %v3049_v19, %v563_v51 }
  0xf1   :  { %v695_v56 = vsel %vm685_vm8, %v692_v46, %v694_v52  ;;  %v699_v57 = vsel %vm685_vm8, %v696_v47, %v698_v53  ;;  %v568_v5 = vshll.u32 %v3049_v19, %v562_v43  ;;  %v569_v6 = vshrl.u32 %v3050_v21, %v563_v51 }
  0xf2   :  { %v3184_v60 = vmul.u32.u64.low %v3163_v14, %v699_v57  ;;  %v3185_v62 = vmul.u32.u64.high %v3163_v14, %v699_v57, %v3184_v60  ;;  %v3188_v0 = vmul.u32.u64.low %v3163_v14, %v695_v56  ;;  %v3189_v1 = vmul.u32.u64.high %v3163_v14, %v695_v56, %v3188_v0 }
  0xf3   :  { %v571_v7 = vshll.u32 %v3050_v21, %v562_v43  ;;  %v572_v8 = vshrl.u32 %v3051_v23, %v563_v51  ;;  %v574_v9 = vshll.u32 %v3051_v23, %v562_v43  ;;  %v575_v10 = vshrl.u32 %v3052_v25, %v563_v51 }
  0xf4   :  { %v567_v11 = vor.u32 %v566_v3, %v565_v2  ;;  %v570_v12 = vor.u32 %v569_v6, %v568_v5  ;;  %v577_v13 = vshll.u32 %v3052_v25, %v562_v43  ;;  %v578_v15 = vshrl.u32 %v3053_v35, %v563_v51 }
  0xf5   :  { %v707_v17 = vmul.u32 %v3163_v14, %v691_v55  ;;  %vm709_vm9 = vc.u32 %v3185_v62, %v3188_v0  ;;  %v710_v18 = vadd.s32 1, %v3189_v1  ;;  %v573_v20 = vor.u32 %v572_v8, %v571_v7 }
  0xf6   :  { %v564_v22 = vshrl.u32 %v3048_v16, %v563_v51  ;;  %v576_v24 = vor.u32 %v575_v10, %v574_v9  ;;  %v579_v26 = vor.u32 %v578_v15, %v577_v13  ;;  %vm580_vm10 = vcmp.lt.s32.totalorder %v561_v59, 1 }
  0xf7   :  { %v711_v27 = vsel %vm709_vm9, %v710_v18, %v3189_v1  ;;  %vm582_vm11 = vcmp.lt.s32.totalorder %v561_v59, 3  ;;  %vm583_vm12 = vcmp.lt.s32.totalorder %v561_v59, 4  ;;  %v588_v31 = vsel %vm580_vm10, %v567_v11, %v570_v12 }
  0xf8   :  { %v712_v32 = vadd.s32 %v711_v27, %v707_v17  ;;  %v585_v33 = vsel %vm583_vm12, %v573_v20, 2102212464  ;;  %v589_v34 = vsel %vm583_vm12, %v576_v24, 920167782  ;;  %v592_v14 = vsel %vm580_vm10, %v570_v12, %v573_v20 }
  0xf9   :  { %vm581_vm13 = vcmp.lt.s32.totalorder %v561_v59, 2  ;;  %v584_v36 = vsel %vm580_vm10, %v564_v22, %v567_v11  ;;  %v590_v37 = vsel %vm582_vm11, %v573_v20, %v589_v34  ;;  %v593_v38 = vsel %vm583_vm12, %v579_v26, 1326507024 }
  0xfa   :  { %v713_v39 = vadd.s32 536870912, %v712_v32  ;;  %v586_v40 = vsel %vm582_vm11, %v570_v12, %v585_v33  ;;  %v591_v41 = vsel %vm581_vm13, %v588_v31, %v590_v37  ;;  %v594_v42 = vsel %vm582_vm11, %v576_v24, %v593_v38 }
  0xfb   :  { %v595_v43 = vsel %vm581_vm13, %v592_v14, %v594_v42  ;;  %v3208_v44 = vmul.u32.u64.low %v596_v54, %v591_v41  ;;  %v3209_v45 = vmul.u32.u64.high %v596_v54, %v591_v41, %v3208_v44  ;;  %v587_v49 = vsel %vm581_vm13, %v584_v36, %v586_v40 }
  0xfc   :  { %v714_v46 = vshrl.u32 %v713_v39, 30  ;;  %v3211_v47 = vmul.u32.u64.low %v596_v54, %v595_v43  ;;  %v3212_v48 = vmul.u32.u64.high %v596_v54, %v595_v43, %v3211_v47  ;;  %v603_v53 = vmul.u32 %v596_v54, %v587_v49 }
  0xfd   :  { %v606_v51 = vadd.s32 1, %v3209_v45  ;;  %v708_v8 = vadd.s32 %v3188_v0, %v3185_v62  ;;  %vm3227_vm5 = vcmp.le.f32.partialorder %v548_v4, 0.7853982  ;;  %vm744_vm9 = vweird.f32 %v3151_v58 }
  0xfe   :  { %v715_v50 = vshll.u32 %v714_v46, 30  ;;  %vm605_vm14 = vc.u32 %v3212_v48, %v3208_v44  ;;  %v604_v33 = vadd.s32 %v3208_v44, %v3212_v48  ;;  %v738_v14 = vsub.s32 4, %v714_v46 }
  0xff   :  { %v607_v55 = vsel %vm605_vm14, %v606_v51, %v3209_v45  ;;  %vm640_vm13 = vweird.f32 %v3155_v63 }
 0x100   :  { %v716_v52 = vsub.s32 %v712_v32, %v715_v50  ;;  %v608_v57 = vadd.s32 %v607_v55, %v603_v53  ;;  %v739_v43 = vsel %vm654_vm1, %v738_v14, %v714_v46  ;;  %v757_v46 = vld [vmem:[%s3496_s3 + $0x8] sm:$0xff] }
 0x101   :  { %v741_v48 = vsel %vm653_vm3, 0, %v739_v43  ;;  %v768_v43 = vpop.permute.xlu1 %767 }
 0x102   :  { %v718_v56 = vsub.s32 0, %v716_v52  ;;  %v609_v60 = vadd.s32 536870912, %v608_v57  ;;  %v745_v50 = vadd.s32 3, %v741_v48 }
 0x104   :  { %v2706_v59 = vmin.u32 %v718_v56, %v716_v52  ;;  %v610_v2 = vshrl.u32 %v609_v60, 30  ;;  %v746_v56 = vand.u32 3, %v745_v50 }
 0x106   :  { %v720_v1 = vclz %v2706_v59  ;;  %v611_v5 = vshll.u32 %v610_v2, 30  ;;  %v775_v59 = vsel %vm770_vm2, %v757_v46, 0  ;;  %vm751_vm6 = vcmp.eq.s32.totalorder %v746_v56, 2 }
 0x107   :  { %vm748_vm7 = vcmp.eq.s32.totalorder %v746_v56, 0  ;;  %vm747_vm8 = vcmp.lt.s32.totalorder %v746_v56, 2 }
 0x108   :  { %v2707_v3 = vadd.s32 4294967294, %v720_v1  ;;  %v612_v7 = vsub.s32 %v608_v57, %v611_v5 }
 0x10a   :  { %vm2708_vm15 = vcmp.lt.s32.totalorder %v2707_v3, 0  ;;  %v614_v10 = vsub.s32 0, %v612_v7 }
 0x10b   :  { %v723_v6 = vsel %vm2708_vm15, 0, %v2707_v3 }
 0x10c   :  { %v724_v9 = vsub.s32 32, %v723_v6  ;;  %v728_v54 = vsub.s32 4294967266, %v723_v6  ;;  %v725_v11 = vshll.u32 %v716_v52, %v723_v6  ;;  %v2702_v15 = vmin.u32 %v614_v10, %v612_v7 }
 0x10d   :  { %v634_v52 = vsub.s32 4, %v610_v2  ;;  %v3240_v6 = vand.u32 4294901760, %v775_v59 }
 0x10e   :  { %v726_v12 = vshrl.u32 %v708_v8, %v724_v9  ;;  %v729_v13 = vadd.s32 127, %v728_v54  ;;  %v616_v20 = vclz %v2702_v15 }
 0x10f   :  { %v635_v57 = vsel %vm550_vm4, %v634_v52, %v610_v2  ;;  %v855_v10 = vsub.f32 %v775_v59, %v3240_v6 }
 0x110   :  { %v727_v17 = vor.u32 %v726_v12, %v725_v11  ;;  %v730_v18 = vshll.u32 %v729_v13, 23  ;;  %v2703_v24 = vadd.s32 4294967294, %v616_v20  ;;  %v637_v5 = vsel %vm3227_vm5, 0, %v635_v57 }
 0x111   :  { %v641_v9 = vadd.s32 3, %v637_v5  ;;  %v856_v15 = vand.u32 4294901760, %v855_v10 }
 0x112   :  { %v731_v22 = vor.u32 4788187, %v730_v18  ;;  %v734_v27 = vcvt.s32.f32 %v727_v17  ;;  %vm2704_vm0 = vcmp.lt.s32.totalorder %v2703_v24, 0 }
 0x113   :  { %v619_v32 = vsel %vm2704_vm0, 0, %v2703_v24  ;;  %v642_v12 = vand.u32 3, %v641_v9 }
 0x114   :  { %v732_v26 = vand.u32 2147483647, %v731_v22  ;;  %v620_v62 = vsub.s32 32, %v619_v32  ;;  %v624_v0 = vsub.s32 4294967266, %v619_v32  ;;  %v621_v36 = vshll.u32 %v612_v7, %v619_v32 }
 0x115   :  { %vm647_vm10 = vcmp.eq.s32.totalorder %v642_v12, 2  ;;  %vm644_vm11 = vcmp.eq.s32.totalorder %v642_v12, 0  ;;  %vm643_vm12 = vcmp.lt.s32.totalorder %v642_v12, 2 }
 0x116   :  { %v735_v31 = vmul.f32 %v734_v27, %v732_v26  ;;  %v622_v37 = vshrl.u32 %v604_v33, %v620_v62  ;;  %v625_v38 = vadd.s32 127, %v624_v0  ;;  %v857_v27 = vsub.f32 %v855_v10, %v856_v15 }
 0x118   :  { %v736_v34 = vxor.u32 2147483648, %v735_v31  ;;  %v623_v41 = vor.u32 %v622_v37, %v621_v36  ;;  %v626_v42 = vshll.u32 %v625_v38, 23  ;;  %v1487_v38 = vld [vmem:[%s3498_s5] sm:$0xff] }
 0x11a   :  { %v737_v39 = vsel %vm654_vm1, %v736_v34, %v735_v31  ;;  %v627_v44 = vor.u32 4788187, %v626_v42  ;;  %v630_v47 = vcvt.s32.f32 %v623_v41  ;;  %v858_v34 = vand.u32 4294901760, %v857_v27 }
 0x11b   :  { %v740_v40 = vsel %vm653_vm3, %v3151_v58, %v737_v39 }
 0x11c   :  { %3001 = vcosq.f32 %v740_v40  ;;  %v628_v45 = vand.u32 2147483647, %v627_v44 }
 0x11d   :  { %3003 = vsinq.f32 %v740_v40 }
 0x11e   :  { %v631_v49 = vmul.f32 %v630_v47, %v628_v45  ;;  %v763_v47 = vpop.permute.xlu1 %762 }
 0x120   :  { %v632_v51 = vxor.u32 2147483648, %v631_v49 }
 0x122   :  { %v633_v53 = vsel %vm550_vm4, %v632_v51, %v631_v49 }
 0x123   :  { %v636_v55 = vsel %vm3227_vm5, %v3155_v63, %v633_v53 }
 0x124   :  { %3005 = vcosq.f32 %v636_v55 }
 0x125   :  { %3007 = vsinq.f32 %v636_v55 }
 0x129   :  { %v3002_v60 = vpop.eup %3001 }
 0x12a   :  { %v3004_v4 = vpop.eup %3003  ;;  %v752_v1 = vxor.u32 2147483648, %v3002_v60 }
 0x12b   :  { %v749_v3 = vxor.u32 2147483648, %v3004_v4 }
 0x12c   :  { %v753_v7 = vsel %vm751_vm6, %v752_v1, %v3004_v4 }
 0x12d   :  { %v750_v8 = vsel %vm748_vm7, %v3002_v60, %v749_v3 }
 0x12e   :  { %v754_v2 = vsel %vm747_vm8, %v750_v8, %v753_v7 }
 0x12f   :  { %v755_v54 = vsel %vm744_vm9, nan, %v754_v2 }
 0x130   :  { %v806_v11 = vand.u32 4294901760, %v755_v54 }
 0x131   :  { %v3006_v17 = vpop.eup %3005 }
 0x132   :  { %2839 = vmatprep.subr.mxu0 %v806_v11  ;;  %v894_v13 = vsub.f32 %v755_v54, %v806_v11  ;;  %v3008_v20 = vpop.eup %3007  ;;  %v648_v22 = vxor.u32 2147483648, %v3006_v17 }
 0x133   :  { %2840 = vmatpush3.msra.mxu0 %v806_v11  ;;  %v645_v24 = vxor.u32 2147483648, %v3008_v20 }
 0x134   :  { %v895_v18 = vand.u32 4294901760, %v894_v13  ;;  %v649_v58 = vsel %vm647_vm10, %v648_v22, %v3008_v20 }
 0x135   :  { %v646_v31 = vsel %vm644_vm11, %v3006_v17, %v645_v24 }
 0x136   :  { %v896_v26 = vsub.f32 %v894_v13, %v895_v18  ;;  %v650_v33 = vsel %vm643_vm12, %v646_v31, %v649_v58 }
 0x137   :  { %v651_v62 = vsel %vm640_vm13, nan, %v650_v33 }
 0x138   :  { %v897_v32 = vand.u32 4294901760, %v896_v26  ;;  %v809_v0 = vand.u32 4294901760, %v651_v62 }
 0x13a   :  { %2846 = vmatprep.subr.mxu1 %v897_v32  ;;  %2841 = vmatprep.subr.mxu0 %v809_v0  ;;  %v901_v14 = vsub.f32 %v651_v62, %v809_v0 }
 0x13b   :  { %2847 = vmatpush3.msra.mxu1 %v897_v32  ;;  %2842 = vmatpush3.msra.mxu0 %v809_v0 }
 0x13c   :  { %2853 = vmatprep.subr.mxu0 %v894_v13  ;;  %2844 = vmatmul.mubr.f32.vlgmr.msra.gmra.mxu0 %v858_v34  ;;  %v902_v36 = vand.u32 4294901760, %v901_v14 }
 0x13d   :  { %2854 = vmatpush3.msra.mxu0 %v894_v13  ;;  %2857 = vmatprep.mubr.f32.mxu0 %v3135_v29  ;;  %v1502_v29 = vsel %vm770_vm2, %v1487_v38, 0 }
 0x13e   :  { %2855 = vmatprep.subr.mxu0 %v901_v14  ;;  %v903_v37 = vsub.f32 %v901_v14, %v902_v36 }
 0x13f   :  { %2856 = vmatpush3.msra.mxu0 %v901_v14 }
 0x140   :  { %2867 = vmatprep.subr.mxu0 %v895_v18  ;;  %2858 = vmatmul.mubr.f32.vlgmr.msra.gmra.mxu0 %v855_v10  ;;  %v904_v63 = vand.u32 4294901760, %v903_v37 }
 0x141   :  { %2868 = vmatpush3.msra.mxu0 %v895_v18  ;;  %2871 = vmatprep.mubr.f32.mxu0 %v3132_v28 }
 0x142   :  { %2848 = vmatprep.subr.mxu1 %v904_v63  ;;  %2869 = vmatprep.subr.mxu0 %v902_v36 }
 0x143   :  { %2849 = vmatpush3.msra.mxu1 %v904_v63  ;;  %2870 = vmatpush3.msra.mxu0 %v902_v36 }
 0x144   :  { %2851 = vmatmul.mubr.f32.vlgmr.msra.gmra.mxu1 %v3240_v6  ;;  %2860 = vmatprep.subr.mxu1 %v806_v11 }
 0x145   :  { %2861 = vmatpush3.msra.mxu1 %v806_v11  ;;  %2864 = vmatprep.mubr.f32.mxu1 %v846_v30  ;;  %v3257_v30 = vand.u32 4294901760, %v1502_v29 }
 0x146   :  { %2862 = vmatprep.subr.mxu1 %v809_v0  ;;  %2872 = vmatmul.mubr.f32.vlgmr.msra.gmra.mxu0 %v3240_v6 }
 0x147   :  { %2863 = vmatpush3.msra.mxu1 %v809_v0  ;;  %v3260_v39 = vsub.f32 %v1502_v29, %v3257_v30 }
 0x148   :  { %2865 = vmatmul.mubr.f32.vlgmr.msra.gmra.mxu1 %v856_v15  ;;  %2874 = vmatprep.subr.mxu1 %v806_v11 }
 0x149   :  { %2875 = vmatpush3.msra.mxu1 %v806_v11  ;;  %2878 = vmatprep.mubr.f32.mxu1 %v3132_v28  ;;  %v1576_v40 = vand.u32 4294901760, %v3260_v39 }
 0x14a   :  { %2876 = vmatprep.subr.mxu1 %v809_v0 }
 0x14b   :  { %2877 = vmatpush3.msra.mxu1 %v809_v0  ;;  %v1577_v28 = vsub.f32 %v3260_v39, %v1576_v40 }
 0x14c   :  { %2879 = vmatmul.mubr.f32.vlgmr.msra.gmra.mxu1 %v3240_v6 }
 0x14d   :  { %2892 = vmatprep.mubr.f32.mxu1 %v3257_v30  ;;  %v1578_v41 = vand.u32 4294901760, %v1577_v28 }
 0x14f   :  { %2885 = vmatprep.mubr.f32.mxu0 %v1578_v41 }
 0x1fc   :  { %v2845_v42 = vpop.f32.mrf.mxu0 }
 0x1fd   :  { %v861_v48 = vadd.f32 %v2845_v42, %v768_v43 }
 0x1fe   :  { %v850_v44 = vpop.f32.mrf.mxu0 }
 0x1ff   :  { %v851_v51 = vadd.f32 %v850_v44, %v763_v47 }
 0x200   :  { %v2859_v45 = vpop.f32.mrf.mxu0 }
 0x202   :  { %v1023_v50 = vpop.f32.mrf.mxu0 }
 0x204   :  { %v2852_v49 = vpop.f32.mrf.mxu1 }
 0x205   :  { %v948_v52 = vadd.f32 %v2852_v49, %v861_v48 }
 0x206   :  { %v941_v61 = vpop.f32.mrf.mxu1  ;;  %v2873_v56 = vpop.f32.mrf.mxu0 }
 0x207   :  { %v1031_v53 = vadd.f32 %v2859_v45, %v948_v52  ;;  %v942_v46 = vadd.f32 %v941_v61, %v851_v51 }
 0x208   :  { %v2866_v55 = vpop.f32.mrf.mxu1  ;;  %v1190_v3 = vpop.f32.mrf.mxu0 }
 0x209   :  { %v1024_v57 = vadd.f32 %v1023_v50, %v942_v46  ;;  %v1114_v59 = vadd.f32 %v2866_v55, %v1031_v53 }
 0x20a   :  { %v1105_v60 = vpop.f32.mrf.mxu1 }
 0x20b   :  { %v1197_v4 = vadd.f32 %v2873_v56, %v1114_v59  ;;  %v1106_v1 = vadd.f32 %v1105_v60, %v1024_v57 }
 0x20c   :  { %v2880_v5 = vpop.f32.mrf.mxu1 }
 0x20d   :  { %v1191_v6 = vadd.f32 %v1190_v3, %v1106_v1  ;;  %v3267_v7 = vadd.f32 %v2880_v5, %v1197_v4 }
 0x20e   :  { %v1269_v8 = vpop.f32.mrf.mxu1 }
 0x20f   :  { %v1383_v2 = vand.u32 2147483647, %v3267_v7  ;;  %v1386_v9 = vand.u32 2139095040, %v3267_v7  ;;  %v3271_v54 = vadd.f32 %v1269_v8, %v1191_v6  ;;  %vm1385_vm13 = vcmp.lt.s32.totalorder %v3267_v7, 0 }
 0x211   :  { %v1387_v10 = vshrl.u32 %v1386_v9, 23  ;;  %v1390_v11 = vand.u32 8388607, %v1383_v2  ;;  %v1282_v12 = vand.u32 2139095040, %v3271_v54  ;;  %v1279_v15 = vand.u32 2147483647, %v3271_v54 }
 0x213   :  { %v2713_v13 = vadd.s32 4294967169, %v1387_v10  ;;  %v1283_v17 = vshrl.u32 %v1282_v12, 23  ;;  %v1391_v20 = vor.u32 8388608, %v1390_v11  ;;  %v1286_v24 = vand.u32 8388607, %v1279_v15 }
 0x215   :  { %v1393_v18 = vadd.s32 1, %v2713_v13  ;;  %v2709_v22 = vadd.s32 4294967169, %v1283_v17  ;;  %v3279_v32 = vshll.u32 %v1391_v20, 8  ;;  %v1287_v0 = vor.u32 8388608, %v1286_v24 }
 0x217   :  { %vm1394_vm14 = vcmp.gt.s32.totalorder %v1393_v18, 0  ;;  %v1289_v58 = vadd.s32 1, %v2709_v22  ;;  %v1327_v4 = vshll.u32 %v1287_v0, 8 }
 0x218   :  { %v1395_v26 = vsel %vm1394_vm14, %v1393_v18, 0  ;;  %vm1384_vm14 = vcmp.le.f32.partialorder %v1383_v2, 0.7853982 }
 0x219   :  { %v1396_v27 = vshrl.u32 %v1395_v26, 5  ;;  %v1397_v31 = vand.u32 31, %v1395_v26  ;;  %vm1290_vm15 = vcmp.gt.s32.totalorder %v1289_v58, 0 }
 0x21a   :  { %v1291_v47 = vsel %vm1290_vm15, %v1289_v58, 0  ;;  %vm1281_vm15 = vcmp.lt.s32.totalorder %v3271_v54, 0 }
 0x21b   :  { %v1398_v33 = vsub.s32 32, %v1397_v31  ;;  %v1400_v62 = vshll.u32 %v3048_v16, %v1397_v31  ;;  %v1403_v34 = vshll.u32 %v3049_v19, %v1397_v31  ;;  %v1406_v14 = vshll.u32 %v3050_v21, %v1397_v31 }
 0x21c   :  { %v1409_v36 = vshll.u32 %v3051_v23, %v1397_v31  ;;  %v1412_v37 = vshll.u32 %v3052_v25, %v1397_v31  ;;  %vm1415_vm0 = vcmp.lt.s32.totalorder %v1396_v27, 1  ;;  %vm1417_vm1 = vcmp.lt.s32.totalorder %v1396_v27, 3 }
 0x21d   :  { %v1401_v63 = vshrl.u32 %v3049_v19, %v1398_v33  ;;  %v1404_v38 = vshrl.u32 %v3050_v21, %v1398_v33  ;;  %v1407_v29 = vshrl.u32 %v3051_v23, %v1398_v33  ;;  %v1399_v28 = vshrl.u32 %v3048_v16, %v1398_v33 }
 0x21e   :  { %v1410_v41 = vshrl.u32 %v3052_v25, %v1398_v33  ;;  %v1413_v42 = vshrl.u32 %v3053_v35, %v1398_v33  ;;  %vm1418_vm3 = vcmp.lt.s32.totalorder %v1396_v27, 4  ;;  %v1293_v50 = vand.u32 31, %v1291_v47 }
 0x21f   :  { %v1402_v43 = vor.u32 %v1401_v63, %v1400_v62  ;;  %v1405_v44 = vor.u32 %v1404_v38, %v1403_v34  ;;  %v1408_v45 = vor.u32 %v1407_v29, %v1406_v14  ;;  %vm1416_vm4 = vcmp.lt.s32.totalorder %v1396_v27, 2 }
 0x220   :  { %v1411_v48 = vor.u32 %v1410_v41, %v1409_v36  ;;  %v1414_v49 = vor.u32 %v1413_v42, %v1412_v37  ;;  %v1294_v57 = vsub.s32 32, %v1293_v50  ;;  %v1292_v6 = vshrl.u32 %v1291_v47, 5 }
 0x221   :  { %v1419_v51 = vsel %vm1415_vm0, %v1399_v28, %v1402_v43  ;;  %v1420_v52 = vsel %vm1418_vm3, %v1408_v45, 2102212464  ;;  %v1423_v61 = vsel %vm1415_vm0, %v1402_v43, %v1405_v44  ;;  %v1427_v53 = vsel %vm1415_vm0, %v1405_v44, %v1408_v45 }
 0x222   :  { %v1421_v46 = vsel %vm1417_vm1, %v1405_v44, %v1420_v52  ;;  %v1424_v55 = vsel %vm1418_vm3, %v1411_v48, 920167782  ;;  %v1428_v56 = vsel %vm1418_vm3, %v1414_v49, 1326507024  ;;  %v1296_v12 = vshll.u32 %v3048_v16, %v1293_v50 }
 0x223   :  { %v1425_v59 = vsel %vm1417_vm1, %v1408_v45, %v1424_v55  ;;  %v1429_v60 = vsel %vm1417_vm1, %v1411_v48, %v1428_v56  ;;  %v1422_v1 = vsel %vm1416_vm4, %v1419_v51, %v1421_v46  ;;  %v1297_v13 = vshrl.u32 %v3049_v19, %v1294_v57 }
 0x224   :  { %v1426_v3 = vsel %vm1416_vm4, %v1423_v61, %v1425_v59  ;;  %v1430_v5 = vsel %vm1416_vm4, %v1427_v53, %v1429_v60  ;;  %v1299_v17 = vshll.u32 %v3049_v19, %v1293_v50  ;;  %v1300_v18 = vshrl.u32 %v3050_v21, %v1294_v57 }
 0x225   :  { %v3300_v8 = vmul.u32.u64.low %v3279_v32, %v1430_v5  ;;  %v3301_v9 = vmul.u32.u64.high %v3279_v32, %v1430_v5, %v3300_v8  ;;  %v3304_v10 = vmul.u32.u64.low %v3279_v32, %v1426_v3  ;;  %v3305_v11 = vmul.u32.u64.high %v3279_v32, %v1426_v3, %v3304_v10 }
 0x226   :  { %v1302_v20 = vshll.u32 %v3050_v21, %v1293_v50  ;;  %v1303_v22 = vshrl.u32 %v3051_v23, %v1294_v57  ;;  %v1305_v24 = vshll.u32 %v3051_v23, %v1293_v50  ;;  %v1306_v26 = vshrl.u32 %v3052_v25, %v1294_v57 }
 0x227   :  { %v1298_v58 = vor.u32 %v1297_v13, %v1296_v12  ;;  %v1301_v27 = vor.u32 %v1300_v18, %v1299_v17  ;;  %v1308_v31 = vshll.u32 %v3052_v25, %v1293_v50  ;;  %v1309_v33 = vshrl.u32 %v3053_v35, %v1294_v57 }
 0x228   :  { %v1438_v62 = vmul.u32 %v3279_v32, %v1422_v1  ;;  %vm1440_vm5 = vc.u32 %v3301_v9, %v3304_v10  ;;  %v1441_v0 = vadd.s32 1, %v3305_v11  ;;  %v1304_v34 = vor.u32 %v1303_v22, %v1302_v20 }
 0x229   :  { %v1295_v14 = vshrl.u32 %v3048_v16, %v1294_v57  ;;  %v1307_v36 = vor.u32 %v1306_v26, %v1305_v24  ;;  %v1310_v37 = vor.u32 %v1309_v33, %v1308_v31  ;;  %vm1311_vm6 = vcmp.lt.s32.totalorder %v1292_v6, 1 }
 0x22a   :  { %v1442_v63 = vsel %vm1440_vm5, %v1441_v0, %v3305_v11  ;;  %vm1313_vm7 = vcmp.lt.s32.totalorder %v1292_v6, 3  ;;  %vm1314_vm8 = vcmp.lt.s32.totalorder %v1292_v6, 4  ;;  %v1319_v38 = vsel %vm1311_vm6, %v1298_v58, %v1301_v27 }
 0x22b   :  { %v1443_v29 = vadd.s32 %v1442_v63, %v1438_v62  ;;  %v1316_v28 = vsel %vm1314_vm8, %v1304_v34, 2102212464  ;;  %v1320_v41 = vsel %vm1314_vm8, %v1307_v36, 920167782  ;;  %v1323_v32 = vsel %vm1311_vm6, %v1301_v27, %v1304_v34 }
 0x22c   :  { %vm1312_vm9 = vcmp.lt.s32.totalorder %v1292_v6, 2  ;;  %v1315_v42 = vsel %vm1311_vm6, %v1295_v14, %v1298_v58  ;;  %v1321_v43 = vsel %vm1313_vm7, %v1304_v34, %v1320_v41  ;;  %v1324_v44 = vsel %vm1314_vm8, %v1310_v37, 1326507024 }
 0x22d   :  { %v1444_v45 = vadd.s32 536870912, %v1443_v29  ;;  %v1317_v47 = vsel %vm1313_vm7, %v1301_v27, %v1316_v28  ;;  %v1322_v48 = vsel %vm1312_vm9, %v1319_v38, %v1321_v43  ;;  %v1325_v49 = vsel %vm1313_vm7, %v1307_v36, %v1324_v44 }
 0x22e   :  { %v1326_v50 = vsel %vm1312_vm9, %v1323_v32, %v1325_v49  ;;  %v3324_v51 = vmul.u32.u64.low %v1327_v4, %v1322_v48  ;;  %v3325_v52 = vmul.u32.u64.high %v1327_v4, %v1322_v48, %v3324_v51  ;;  %v1318_v55 = vsel %vm1312_vm9, %v1315_v42, %v1317_v47 }
 0x22f   :  { %v1445_v61 = vshrl.u32 %v1444_v45, 30  ;;  %v3327_v53 = vmul.u32.u64.low %v1327_v4, %v1326_v50  ;;  %v3328_v46 = vmul.u32.u64.high %v1327_v4, %v1326_v50, %v3327_v53  ;;  %v1334_v60 = vmul.u32 %v1327_v4, %v1318_v55 }
 0x230   :  { %v1337_v57 = vadd.s32 1, %v3325_v52  ;;  %v1439_v22 = vadd.s32 %v3304_v10, %v3301_v9  ;;  %vm3343_vm0 = vcmp.le.f32.partialorder %v1279_v15, 0.7853982  ;;  %vm1475_vm5 = vweird.f32 %v3267_v7 }
 0x231   :  { %v1446_v56 = vshll.u32 %v1445_v61, 30  ;;  %vm1336_vm10 = vc.u32 %v3328_v46, %v3324_v51  ;;  %v1335_v28 = vadd.s32 %v3324_v51, %v3328_v46  ;;  %v1469_v32 = vsub.s32 4, %v1445_v61 }
 0x232   :  { %v1338_v1 = vsel %vm1336_vm10, %v1337_v57, %v3325_v52  ;;  %vm1371_vm9 = vweird.f32 %v3271_v54  ;;  %vm3055_vm10 = vmmov 0  }
 0x233   :  { %v1447_v59 = vsub.s32 %v1443_v29, %v1446_v56  ;;  %v1339_v5 = vadd.s32 %v1338_v1, %v1334_v60  ;;  %v1470_v50 = vsel %vm1385_vm13, %v1469_v32, %v1445_v61  ;;  %v1488_v61 = vld [vmem:[%s3498_s5 + $0x8] sm:$0xff] }
 0x234   :  { %v1472_v46 = vsel %vm1384_vm14, 0, %v1470_v50 }
 0x235   :  { %v1449_v3 = vsub.s32 0, %v1447_v59  ;;  %v1340_v8 = vadd.s32 536870912, %v1339_v5  ;;  %v1476_v56 = vadd.s32 3, %v1472_v46 }
 0x237   :  { %v2714_v6 = vmin.u32 %v1449_v3, %v1447_v59  ;;  %v1341_v12 = vshrl.u32 %v1340_v8, 30  ;;  %v1477_v3 = vand.u32 3, %v1476_v56 }
 0x239   :  { %v1451_v11 = vclz %v2714_v6  ;;  %v1342_v17 = vshll.u32 %v1341_v12, 30  ;;  %v1505_v6 = vsel %vm770_vm2, %v1488_v61, 0  ;;  %vm1482_vm1 = vcmp.eq.s32.totalorder %v1477_v3, 2 }
 0x23a   :  { %vm1479_vm3 = vcmp.eq.s32.totalorder %v1477_v3, 0  ;;  %vm1478_vm4 = vcmp.lt.s32.totalorder %v1477_v3, 2 }
 0x23b   :  { %v2715_v13 = vadd.s32 4294967294, %v1451_v11  ;;  %v1343_v20 = vsub.s32 %v1339_v5, %v1342_v17 }
 0x23d   :  { %vm2716_vm11 = vcmp.lt.s32.totalorder %v2715_v13, 0  ;;  %v1345_v26 = vsub.s32 0, %v1343_v20 }
 0x23e   :  { %v1454_v18 = vsel %vm2716_vm11, 0, %v2715_v13 }
 0x23f   :  { %v1455_v24 = vsub.s32 32, %v1454_v18  ;;  %v1459_v4 = vsub.s32 4294967266, %v1454_v18  ;;  %v1456_v58 = vshll.u32 %v1447_v59, %v1454_v18  ;;  %v2710_v33 = vmin.u32 %v1345_v26, %v1343_v20 }
 0x240   :  { %v1365_v59 = vsub.s32 4, %v1341_v12  ;;  %v3356_v18 = vand.u32 4294901760, %v1505_v6 }
 0x241   :  { %v1457_v27 = vshrl.u32 %v1439_v22, %v1455_v24  ;;  %v1460_v31 = vadd.s32 127, %v1459_v4  ;;  %v1347_v34 = vclz %v2710_v33 }
 0x242   :  { %v1366_v5 = vsel %vm1281_vm15, %v1365_v59, %v1341_v12  ;;  %v1585_v26 = vsub.f32 %v1505_v6, %v3356_v18 }
 0x243   :  { %v1458_v62 = vor.u32 %v1457_v27, %v1456_v58  ;;  %v1461_v0 = vshll.u32 %v1460_v31, 23  ;;  %v2711_v36 = vadd.s32 4294967294, %v1347_v34  ;;  %v1368_v17 = vsel %vm3343_vm0, 0, %v1366_v5 }
 0x244   :  { %v1372_v24 = vadd.s32 3, %v1368_v17  ;;  %v1586_v33 = vand.u32 4294901760, %v1585_v26 }
 0x245   :  { %v1462_v14 = vor.u32 4788187, %v1461_v0  ;;  %v1465_v63 = vcvt.s32.f32 %v1458_v62  ;;  %vm2712_vm12 = vcmp.lt.s32.totalorder %v2711_v36, 0 }
 0x246   :  { %v1350_v29 = vsel %vm2712_vm12, 0, %v2711_v36  ;;  %v1373_v27 = vand.u32 3, %v1372_v24 }
 0x247   :  { %v1463_v37 = vand.u32 2147483647, %v1462_v14  ;;  %v1351_v9 = vsub.s32 32, %v1350_v29  ;;  %v1355_v10 = vsub.s32 4294967266, %v1350_v29  ;;  %v1352_v42 = vshll.u32 %v1343_v20, %v1350_v29 }
 0x248   :  { %vm1378_vm6 = vcmp.eq.s32.totalorder %v1373_v27, 2  ;;  %vm1375_vm7 = vcmp.eq.s32.totalorder %v1373_v27, 0  ;;  %vm1374_vm8 = vcmp.lt.s32.totalorder %v1373_v27, 2 }
 0x249   :  { %v1466_v38 = vmul.f32 %v1465_v63, %v1463_v37  ;;  %v1353_v43 = vshrl.u32 %v1335_v28, %v1351_v9  ;;  %v1356_v44 = vadd.s32 127, %v1355_v10  ;;  %v1587_v63 = vsub.f32 %v1585_v26, %v1586_v33 }
 0x24b   :  { %v1467_v41 = vxor.u32 2147483648, %v1466_v38  ;;  %v1354_v48 = vor.u32 %v1353_v43, %v1352_v42  ;;  %v1357_v49 = vshll.u32 %v1356_v44, 23  ;;  %v3054_v44 = vmov 0.0  }
 0x24d   :  { %v1468_v45 = vsel %vm1385_vm13, %v1467_v41, %v1466_v38  ;;  %v1358_v51 = vor.u32 4788187, %v1357_v49  ;;  %v1361_v53 = vcvt.s32.f32 %v1354_v48  ;;  %v1588_v41 = vand.u32 4294901760, %v1587_v63 }
 0x24e   :  { %v1471_v47 = vsel %vm1384_vm14, %v3267_v7, %v1468_v45 }
 0x24f   :  { %3009 = vcosq.f32 %v1471_v47  ;;  %v1359_v52 = vand.u32 2147483647, %v1358_v51 }
 0x250   :  { %3011 = vsinq.f32 %v1471_v47  ;;  %v1494_v47 = vpop.permute.xlu1 %1493 }
 0x251   :  { %v1362_v55 = vmul.f32 %v1361_v53, %v1359_v52 }
 0x253   :  { %v1363_v57 = vxor.u32 2147483648, %v1362_v55 }
 0x255   :  { %v1364_v60 = vsel %vm1281_vm15, %v1363_v57, %v1362_v55 }
 0x256   :  { %v1367_v1 = vsel %vm3343_vm0, %v3271_v54, %v1364_v60 }
 0x257   :  { %3013 = vcosq.f32 %v1367_v1 }
 0x258   :  { %3015 = vsinq.f32 %v1367_v1 }
 0x25c   :  { %v3010_v8 = vpop.eup %3009 }
 0x25d   :  { %v3012_v15 = vpop.eup %3011  ;;  %v1483_v11 = vxor.u32 2147483648, %v3010_v8 }
 0x25e   :  { %v1480_v13 = vxor.u32 2147483648, %v3012_v15 }
 0x25f   :  { %v1484_v20 = vsel %vm1482_vm1, %v1483_v11, %v3012_v15 }
 0x260   :  { %v1481_v22 = vsel %vm1479_vm3, %v3010_v8, %v1480_v13 }
 0x261   :  { %v1485_v12 = vsel %vm1478_vm4, %v1481_v22, %v1484_v20 }
 0x262   :  { %v1486_v4 = vsel %vm1475_vm5, nan, %v1485_v12 }
 0x263   :  { %v1536_v58 = vand.u32 4294901760, %v1486_v4 }
 0x264   :  { %v3014_v62 = vpop.eup %3013 }
 0x265   :  { %2881 = vmatprep.subr.mxu0 %v1536_v58  ;;  %v1624_v31 = vsub.f32 %v1486_v4, %v1536_v58  ;;  %v3016_v34 = vpop.eup %3015  ;;  %v1379_v14 = vxor.u32 2147483648, %v3014_v62 }
 0x266   :  { %2882 = vmatpush3.msra.mxu0 %v1536_v58  ;;  %v1376_v36 = vxor.u32 2147483648, %v3016_v34 }
 0x267   :  { %v1625_v0 = vand.u32 4294901760, %v1624_v31  ;;  %v1380_v7 = vsel %vm1378_vm6, %v1379_v14, %v3016_v34 }
 0x268   :  { %v1377_v38 = vsel %vm1375_vm7, %v3014_v62, %v1376_v36 }
 0x269   :  { %v1626_v37 = vsub.f32 %v1624_v31, %v1625_v0  ;;  %v1381_v28 = vsel %vm1374_vm8, %v1377_v38, %v1380_v7 }
 0x26a   :  { %v1382_v9 = vsel %vm1371_vm9, nan, %v1381_v28 }
 0x26b   :  { %v1627_v29 = vand.u32 4294901760, %v1626_v37  ;;  %v1539_v10 = vand.u32 4294901760, %v1382_v9 }
 0x26d   :  { %2888 = vmatprep.subr.mxu1 %v1627_v29  ;;  %2883 = vmatprep.subr.mxu0 %v1539_v10  ;;  %v1631_v32 = vsub.f32 %v1382_v9, %v1539_v10 }
 0x26e   :  { %2889 = vmatpush3.msra.mxu1 %v1627_v29  ;;  %2884 = vmatpush3.msra.mxu0 %v1539_v10 }
 0x26f   :  { %2886 = vmatmul.mubr.f32.vlgmr.msra.gmra.mxu0 %v1588_v41  ;;  %2895 = vmatprep.subr.mxu0 %v1624_v31  ;;  %v1632_v42 = vand.u32 4294901760, %v1631_v32 }
 0x270   :  { %2896 = vmatpush3.msra.mxu0 %v1624_v31  ;;  %2899 = vmatprep.mubr.f32.mxu0 %v3260_v39 }
 0x271   :  { %2897 = vmatprep.subr.mxu0 %v1631_v32  ;;  %v1633_v43 = vsub.f32 %v1631_v32, %v1632_v42 }
 0x272   :  { %2898 = vmatpush3.msra.mxu0 %v1631_v32 }
 0x273   :  { %2909 = vmatprep.subr.mxu0 %v1625_v0  ;;  %2900 = vmatmul.mubr.f32.vlgmr.msra.gmra.mxu0 %v1585_v26  ;;  %v1634_v54 = vand.u32 4294901760, %v1633_v43 }
 0x274   :  { %2910 = vmatpush3.msra.mxu0 %v1625_v0  ;;  %2913 = vmatprep.mubr.f32.mxu0 %v3257_v30 }
 0x275   :  { %2890 = vmatprep.subr.mxu1 %v1634_v54  ;;  %2911 = vmatprep.subr.mxu0 %v1632_v42 }
 0x276   :  { %2891 = vmatpush3.msra.mxu1 %v1634_v54  ;;  %2912 = vmatpush3.msra.mxu0 %v1632_v42 }
 0x277   :  { %2893 = vmatmul.mubr.f32.vlgmr.msra.gmra.mxu1 %v3356_v18  ;;  %2902 = vmatprep.subr.mxu1 %v1536_v58 }
 0x278   :  { %2903 = vmatpush3.msra.mxu1 %v1536_v58  ;;  %2906 = vmatprep.mubr.f32.mxu1 %v1576_v40 }
 0x279   :  { %2904 = vmatprep.subr.mxu1 %v1539_v10  ;;  %2914 = vmatmul.mubr.f32.vlgmr.msra.gmra.mxu0 %v3356_v18 }
 0x27a   :  { %2905 = vmatpush3.msra.mxu1 %v1539_v10  ;;  %2923 = vmatprep.subr.mxu0 %v3054_v44 }
 0x27b   :  { %2907 = vmatmul.mubr.f32.vlgmr.msra.gmra.mxu1 %v1586_v33  ;;  %2916 = vmatprep.subr.mxu1 %v1536_v58 }
 0x27c   :  { %2917 = vmatpush3.msra.mxu1 %v1536_v58  ;;  %2920 = vmatprep.mubr.f32.mxu1 %v3257_v30  ;;  %v1499_v30 = vpop.permute.xlu0 %1498 }
 0x27d   :  { %2918 = vmatprep.subr.mxu1 %v1539_v10  ;;  %2927 = vmatprep.mubr.msk.f32.mxu0 %vm3055_vm10, %v3054_v44 }
 0x27e   :  { %2919 = vmatpush3.msra.mxu1 %v1539_v10 }
 0x27f   :  { %2921 = vmatmul.mubr.f32.vlgmr.msra.gmra.mxu1 %v3356_v18  ;;  %2930 = vmatprep.subr.mxu1 %v3054_v44 }
 0x280   :  { %2934 = vmatprep.mubr.msk.f32.mxu1 %vm3055_vm10, %v3054_v44 }
 0x32f   :  { %v2887_v39 = vpop.f32.mrf.mxu0 }
 0x330   :  { %v1591_v48 = vadd.f32 %v2887_v39, %v1499_v30 }
 0x331   :  { %v1580_v40 = vpop.f32.mrf.mxu0 }
 0x332   :  { %v1581_v51 = vadd.f32 %v1580_v40, %v1494_v47 }
 0x333   :  { %v2901_v45 = vpop.f32.mrf.mxu0 }
 0x335   :  { %v1753_v50 = vpop.f32.mrf.mxu0 }
 0x337   :  { %v2894_v49 = vpop.f32.mrf.mxu1 }
 0x338   :  { %v1678_v52 = vadd.f32 %v2894_v49, %v1591_v48 }
 0x339   :  { %v1671_v53 = vpop.f32.mrf.mxu1  ;;  %v2915_v57 = vpop.f32.mrf.mxu0 }
 0x33a   :  { %v1761_v46 = vadd.f32 %v2901_v45, %v1678_v52  ;;  %v1672_v55 = vadd.f32 %v1671_v53, %v1581_v51 }
 0x33b   :  { %v2908_v56 = vpop.f32.mrf.mxu1  ;;  %v1920_v3 = vpop.f32.mrf.mxu0 }
 0x33c   :  { %v1754_v59 = vadd.f32 %v1753_v50, %v1672_v55  ;;  %v1844_v2 = vadd.f32 %v2908_v56, %v1761_v46 }
 0x33d   :  { %v1835_v60 = vpop.f32.mrf.mxu1 }
 0x33e   :  { %v1927_v61 = vadd.f32 %v2915_v57, %v1844_v2  ;;  %v1836_v1 = vadd.f32 %v1835_v60, %v1754_v59 }
 0x33f   :  { %v2922_v5 = vpop.f32.mrf.mxu1 }
 0x340   :  { %v1921_v6 = vadd.f32 %v1920_v3, %v1836_v1  ;;  %v3375_v8 = vadd.f32 %v2922_v5, %v1927_v61 }
 0x341   :  { %v1999_v15 = vpop.f32.mrf.mxu1 }
 0x342   :  { %v2113_v11 = vand.u32 2147483647, %v3375_v8  ;;  %v2116_v13 = vand.u32 2139095040, %v3375_v8  ;;  %v3379_v17 = vadd.f32 %v1999_v15, %v1921_v6 }
 0x344   :  { %v2117_v18 = vshrl.u32 %v2116_v13, 23  ;;  %v2120_v20 = vand.u32 8388607, %v2113_v11  ;;  %v2012_v22 = vand.u32 2139095040, %v3379_v17  ;;  %v2009_v24 = vand.u32 2147483647, %v3379_v17 }
 0x346   :  { %v2721_v12 = vadd.s32 4294967169, %v2117_v18  ;;  %v2013_v4 = vshrl.u32 %v2012_v22, 23  ;;  %v2121_v58 = vor.u32 8388608, %v2120_v20  ;;  %v2016_v31 = vand.u32 8388607, %v2009_v24 }
 0x348   :  { %v2123_v26 = vadd.s32 1, %v2721_v12  ;;  %v2717_v27 = vadd.s32 4294967169, %v2013_v4  ;;  %v3387_v14 = vshll.u32 %v2121_v58, 8  ;;  %v2017_v7 = vor.u32 8388608, %v2016_v31 }
 0x34a   :  { %vm2124_vm11 = vcmp.gt.s32.totalorder %v2123_v26, 0  ;;  %v2019_v62 = vadd.s32 1, %v2717_v27  ;;  %v2057_v2 = vshll.u32 %v2017_v7, 8 }
 0x34b   :  { %v2125_v33 = vsel %vm2124_vm11, %v2123_v26, 0  ;;  %vm2115_vm11 = vcmp.lt.s32.totalorder %v3375_v8, 0 }
 0x34c   :  { %v2126_v0 = vshrl.u32 %v2125_v33, 5  ;;  %v2127_v34 = vand.u32 31, %v2125_v33  ;;  %vm2020_vm12 = vcmp.gt.s32.totalorder %v2019_v62, 0 }
 0x34d   :  { %v2021_v45 = vsel %vm2020_vm12, %v2019_v62, 0  ;;  %vm2114_vm12 = vcmp.le.f32.partialorder %v2113_v11, 0.7853982  ;;  %v2217_v11 = vld [vmem:[%s3500_s7] sm:$0xff]  ;;  %s3056_s7 = smov [#allocation2]  }
 0x34e   :  { %v2128_v36 = vsub.s32 32, %v2127_v34  ;;  %v2130_v37 = vshll.u32 %v3048_v16, %v2127_v34  ;;  %v2133_v63 = vshll.u32 %v3049_v19, %v2127_v34  ;;  %v2136_v38 = vshll.u32 %v3050_v21, %v2127_v34  ;;  %s2693_s10 = sshll.u32 %s3056_s7, 4  ;;  %s2694_s10 = int_to_ptr.vmem [resolvable:$true] %s2693_s10 }
 0x34f   :  { %v2139_v29 = vshll.u32 %v3051_v23, %v2127_v34  ;;  %v2142_v28 = vshll.u32 %v3052_v25, %v2127_v34  ;;  %vm2145_vm13 = vcmp.lt.s32.totalorder %v2126_v0, 1  ;;  %vm2147_vm14 = vcmp.lt.s32.totalorder %v2126_v0, 3  ;;  %s3025_s11 = scalar_lea.vmem %s2694_s10, 16  ;;  %s3029_s12 = scalar_lea.vmem %s2694_s10, 32 }
 0x350   :  { %v2131_v9 = vshrl.u32 %v3049_v19, %v2128_v36  ;;  %v2134_v10 = vshrl.u32 %v3050_v21, %v2128_v36  ;;  %v2137_v41 = vshrl.u32 %v3051_v23, %v2128_v36  ;;  %v2129_v32 = vshrl.u32 %v3048_v16, %v2128_v36  ;;  %p3026_p0 = scmp.ne.s32.totalorder %s2694_s10, %s3025_s11  ;;  %p3030_p1 = scmp.lt.s32.totalorder %s2694_s10, %s2694_s10 }
 0x351   :  { %v2140_v42 = vshrl.u32 %v3052_v25, %v2128_v36  ;;  %v2143_v43 = vshrl.u32 %v3053_v35, %v2128_v36  ;;  %vm2148_vm15 = vcmp.lt.s32.totalorder %v2126_v0, 4  ;;  %v2023_v48 = vand.u32 31, %v2021_v45  ;;  %p3031_p2 = scmp.lt.s32.totalorder %s3029_s12, %s3025_s11 }
 0x352   :  { %v2132_v54 = vor.u32 %v2131_v9, %v2130_v37  ;;  %v2135_v39 = vor.u32 %v2134_v10, %v2133_v63  ;;  %v2138_v40 = vor.u32 %v2137_v41, %v2136_v38  ;;  %vm2146_vm0 = vcmp.lt.s32.totalorder %v2126_v0, 2 }
 0x353   :  { %v2141_v30 = vor.u32 %v2140_v42, %v2139_v29  ;;  %v2144_v47 = vor.u32 %v2143_v43, %v2142_v28  ;;  %v2024_v56 = vsub.s32 32, %v2023_v48  ;;  %v2022_v3 = vshrl.u32 %v2021_v45, 5  ;;  %p3032_p3 = por %p3031_p2, %p3030_p1 }
 0x354   :  { %v2149_v49 = vsel %vm2145_vm13, %v2129_v32, %v2132_v54  ;;  %v2150_v50 = vsel %vm2148_vm15, %v2138_v40, 2102212464  ;;  %v2153_v51 = vsel %vm2145_vm13, %v2132_v54, %v2135_v39  ;;  %v2157_v52 = vsel %vm2145_vm13, %v2135_v39, %v2138_v40 }
 0x355   :  { %v2151_v53 = vsel %vm2147_vm14, %v2135_v39, %v2150_v50  ;;  %v2154_v46 = vsel %vm2148_vm15, %v2141_v30, 920167782  ;;  %v2158_v55 = vsel %vm2148_vm15, %v2144_v47, 1326507024  ;;  %v2026_v18 = vshll.u32 %v3048_v16, %v2023_v48  ;;  %p3033_p4 = pnand %p3032_p3, %p3026_p0 }
 0x356   :  { %v2155_v57 = vsel %vm2147_vm14, %v2138_v40, %v2154_v46  ;;  %v2159_v59 = vsel %vm2147_vm14, %v2141_v30, %v2158_v55  ;;  %v2152_v60 = vsel %vm2146_vm0, %v2149_v49, %v2151_v53  ;;  %v2027_v20 = vshrl.u32 %v3049_v19, %v2024_v56 }
 0x357   :  { %v2156_v61 = vsel %vm2146_vm0, %v2153_v51, %v2155_v57  ;;  %v2160_v1 = vsel %vm2146_vm0, %v2157_v52, %v2159_v59  ;;  %v2029_v22 = vshll.u32 %v3049_v19, %v2023_v48  ;;  %v2030_v12 = vshrl.u32 %v3050_v21, %v2024_v56 }
 0x358   :  { %v3408_v5 = vmul.u32.u64.low %v3387_v14, %v2160_v1  ;;  %v3409_v6 = vmul.u32.u64.high %v3387_v14, %v2160_v1, %v3408_v5  ;;  %v3412_v15 = vmul.u32.u64.low %v3387_v14, %v2156_v61  ;;  %v3413_v13 = vmul.u32.u64.high %v3387_v14, %v2156_v61, %v3412_v15 }
 0x359   :  { %v2032_v4 = vshll.u32 %v3050_v21, %v2023_v48  ;;  %v2033_v26 = vshrl.u32 %v3051_v23, %v2024_v56  ;;  %v2035_v58 = vshll.u32 %v3051_v23, %v2023_v48  ;;  %v2036_v27 = vshrl.u32 %v3052_v25, %v2024_v56 }
 0x35a   :  { %v2028_v31 = vor.u32 %v2027_v20, %v2026_v18  ;;  %v2031_v33 = vor.u32 %v2030_v12, %v2029_v22  ;;  %v2038_v62 = vshll.u32 %v3052_v25, %v2023_v48  ;;  %v2039_v0 = vshrl.u32 %v3053_v35, %v2024_v56 }
 0x35b   :  { %v2168_v34 = vmul.u32 %v3387_v14, %v2152_v60  ;;  %vm2170_vm1 = vc.u32 %v3409_v6, %v3412_v15  ;;  %v2171_v19 = vadd.s32 1, %v3413_v13  ;;  %v2034_v21 = vor.u32 %v2033_v26, %v2032_v4 }
 0x35c   :  { %v2025_v36 = vshrl.u32 %v3048_v16, %v2024_v56  ;;  %v2037_v37 = vor.u32 %v2036_v27, %v2035_v58  ;;  %v2040_v23 = vor.u32 %v2039_v0, %v2038_v62  ;;  %vm2041_vm3 = vcmp.lt.s32.totalorder %v2022_v3, 1 }
 0x35d   :  { %v2172_v7 = vsel %vm2170_vm1, %v2171_v19, %v3413_v13  ;;  %vm2043_vm4 = vcmp.lt.s32.totalorder %v2022_v3, 3  ;;  %vm2044_vm5 = vcmp.lt.s32.totalorder %v2022_v3, 4  ;;  %v2049_v25 = vsel %vm2041_vm3, %v2028_v31, %v2031_v33 }
 0x35e   :  { %v2173_v63 = vadd.s32 %v2172_v7, %v2168_v34  ;;  %v2046_v35 = vsel %vm2044_vm5, %v2034_v21, 2102212464  ;;  %v2050_v38 = vsel %vm2044_vm5, %v2037_v37, 920167782  ;;  %v2053_v14 = vsel %vm2041_vm3, %v2031_v33, %v2034_v21 }
 0x35f   :  { %vm2042_vm6 = vcmp.lt.s32.totalorder %v2022_v3, 2  ;;  %v2045_v29 = vsel %vm2041_vm3, %v2025_v36, %v2028_v31  ;;  %v2051_v28 = vsel %vm2043_vm4, %v2034_v21, %v2050_v38  ;;  %v2054_v9 = vsel %vm2044_vm5, %v2040_v23, 1326507024 }
 0x360   :  { %v2174_v10 = vadd.s32 536870912, %v2173_v63  ;;  %v2047_v41 = vsel %vm2043_vm4, %v2031_v33, %v2046_v35  ;;  %v2052_v32 = vsel %vm2042_vm6, %v2049_v25, %v2051_v28  ;;  %v2055_v16 = vsel %vm2043_vm4, %v2037_v37, %v2054_v9 }
 0x361   :  { %v2056_v42 = vsel %vm2042_vm6, %v2053_v14, %v2055_v16  ;;  %v3432_v43 = vmul.u32.u64.low %v2057_v2, %v2052_v32  ;;  %v3433_v54 = vmul.u32.u64.high %v2057_v2, %v2052_v32, %v3432_v43  ;;  %v2048_v30 = vsel %vm2042_vm6, %v2045_v29, %v2047_v41 }
 0x362   :  { %v2175_v39 = vshrl.u32 %v2174_v10, 30  ;;  %v3435_v40 = vmul.u32.u64.low %v2057_v2, %v2056_v42  ;;  %v3436_v45 = vmul.u32.u64.high %v2057_v2, %v2056_v42, %v3435_v40  ;;  %v2064_v50 = vmul.u32 %v2057_v2, %v2048_v30 }
 0x363   :  { %v2067_v48 = vadd.s32 1, %v3433_v54  ;;  %v2169_v3 = vadd.s32 %v3412_v15, %v3409_v6  ;;  %vm2011_vm13 = vcmp.lt.s32.totalorder %v3379_v17, 0  ;;  %vm3454_vm14 = vcmp.le.f32.partialorder %v2009_v24, 0.7853982 }
 0x364   :  { %v2176_v47 = vshll.u32 %v2175_v39, 30  ;;  %vm2066_vm7 = vc.u32 %v3436_v45, %v3432_v43  ;;  %v2065_v19 = vadd.s32 %v3432_v43, %v3436_v45  ;;  %v2199_v7 = vsub.s32 4, %v2175_v39 }
 0x365   :  { %v2068_v51 = vsel %vm2066_vm7, %v2067_v48, %v3433_v54  ;;  %v2225_v40 = vsel %vm770_vm2, %v2217_v11, 0  ;;  %vm2205_vm2 = vweird.f32 %v3375_v8  ;;  %vm2101_vm6 = vweird.f32 %v3379_v17 }
 0x366   :  { %v2177_v49 = vsub.s32 %v2173_v63, %v2176_v47  ;;  %v2069_v53 = vadd.s32 %v2068_v51, %v2064_v50  ;;  %v2200_v29 = vsel %vm2115_vm11, %v2199_v7, %v2175_v39  ;;  %v3462_v48 = vand.u32 4294901760, %v2225_v40 }
 0x367   :  { %v2202_v10 = vsel %vm2114_vm12, 0, %v2200_v29 }
 0x368   :  { %v2179_v52 = vsub.s32 0, %v2177_v49  ;;  %v2070_v55 = vadd.s32 536870912, %v2069_v53  ;;  %v2206_v16 = vadd.s32 3, %v2202_v10 }
 0x36a   :  { %v2722_v46 = vmin.u32 %v2179_v52, %v2177_v49  ;;  %v2071_v57 = vshrl.u32 %v2070_v55, 30  ;;  %v2207_v30 = vand.u32 3, %v2206_v16  ;;  %v2295_v55 = vsub.f32 %v2225_v40, %v3462_v48 }
 0x36c   :  { %v2181_v56 = vclz %v2722_v46  ;;  %v2072_v60 = vshll.u32 %v2071_v57, 30  ;;  %v2095_v42 = vsub.s32 4, %v2071_v57  ;;  %vm2212_vm15 = vcmp.eq.s32.totalorder %v2207_v30, 2 }
 0x36d   :  { %vm2209_vm0 = vcmp.eq.s32.totalorder %v2207_v30, 0  ;;  %vm2208_vm1 = vcmp.lt.s32.totalorder %v2207_v30, 2 }
 0x36e   :  { %v2723_v59 = vadd.s32 4294967294, %v2181_v56  ;;  %v2073_v61 = vsub.s32 %v2069_v53, %v2072_v60  ;;  %v2096_v45 = vsel %vm2011_vm13, %v2095_v42, %v2071_v57 }
 0x36f   :  { %v2098_v24 = vsel %vm3454_vm14, 0, %v2096_v45 }
 0x370   :  { %vm2724_vm8 = vcmp.lt.s32.totalorder %v2723_v59, 0  ;;  %v2075_v13 = vsub.s32 0, %v2073_v61  ;;  %v2102_v53 = vadd.s32 3, %v2098_v24 }
 0x371   :  { %v2184_v1 = vsel %vm2724_vm8, 0, %v2723_v59 }
 0x372   :  { %v2185_v5 = vsub.s32 32, %v2184_v1  ;;  %v2189_v2 = vsub.s32 4294967266, %v2184_v1  ;;  %v2186_v18 = vshll.u32 %v2177_v49, %v2184_v1  ;;  %v2718_v12 = vmin.u32 %v2075_v13, %v2073_v61 }
 0x373   :  { %v2103_v60 = vand.u32 3, %v2102_v53 }
 0x374   :  { %v2187_v20 = vshrl.u32 %v2169_v3, %v2185_v5  ;;  %v2190_v22 = vadd.s32 127, %v2189_v2  ;;  %v2077_v58 = vclz %v2718_v12 }
 0x375   :  { %vm2108_vm3 = vcmp.eq.s32.totalorder %v2103_v60, 2  ;;  %vm2105_vm4 = vcmp.eq.s32.totalorder %v2103_v60, 0  ;;  %vm2104_vm5 = vcmp.lt.s32.totalorder %v2103_v60, 2 }
 0x376   :  { %v2188_v4 = vor.u32 %v2187_v20, %v2186_v18  ;;  %v2191_v26 = vshll.u32 %v2190_v22, 23  ;;  %v2719_v31 = vadd.s32 4294967294, %v2077_v58 }
 0x378   :  { %v2192_v27 = vor.u32 4788187, %v2191_v26  ;;  %v2195_v62 = vcvt.s32.f32 %v2188_v4  ;;  %vm2720_vm9 = vcmp.lt.s32.totalorder %v2719_v31, 0 }
 0x379   :  { %v2080_v0 = vsel %vm2720_vm9, 0, %v2719_v31 }
 0x37a   :  { %v2193_v33 = vand.u32 2147483647, %v2192_v27  ;;  %v2081_v6 = vsub.s32 32, %v2080_v0  ;;  %v2085_v15 = vsub.s32 4294967266, %v2080_v0  ;;  %v2082_v36 = vshll.u32 %v2073_v61, %v2080_v0 }
 0x37b   :  { %v2296_v61 = vand.u32 4294901760, %v2295_v55 }
 0x37c   :  { %v2196_v34 = vmul.f32 %v2195_v62, %v2193_v33  ;;  %v2083_v37 = vshrl.u32 %v2065_v19, %v2081_v6  ;;  %v2086_v23 = vadd.s32 127, %v2085_v15  ;;  %v2222_v15 = vpop.permute.xlu0 %2221 }
 0x37d   :  { %v2297_v20 = vsub.f32 %v2295_v55, %v2296_v61 }
 0x37e   :  { %v2197_v21 = vxor.u32 2147483648, %v2196_v34  ;;  %v2084_v63 = vor.u32 %v2083_v37, %v2082_v36  ;;  %v2087_v35 = vshll.u32 %v2086_v23, 23 }
 0x37f   :  { %v2298_v27 = vand.u32 4294901760, %v2297_v20 }
 0x380   :  { %v2198_v25 = vsel %vm2115_vm11, %v2197_v21, %v2196_v34  ;;  %v2088_v14 = vor.u32 4788187, %v2087_v35  ;;  %v2091_v9 = vcvt.s32.f32 %v2084_v63 }
 0x381   :  { %v2201_v38 = vsel %vm2114_vm12, %v3375_v8, %v2198_v25 }
 0x382   :  { %3017 = vcosq.f32 %v2201_v38  ;;  %v2089_v28 = vand.u32 2147483647, %v2088_v14 }
 0x383   :  { %3019 = vsinq.f32 %v2201_v38 }
 0x384   :  { %v2092_v41 = vmul.f32 %v2091_v9, %v2089_v28 }
 0x386   :  { %v2093_v32 = vxor.u32 2147483648, %v2092_v41 }
 0x388   :  { %v2094_v54 = vsel %vm2011_vm13, %v2093_v32, %v2092_v41 }
 0x389   :  { %v2097_v39 = vsel %vm3454_vm14, %v3379_v17, %v2094_v54 }
 0x38a   :  { %3021 = vcosq.f32 %v2097_v39 }
 0x38b   :  { %3023 = vsinq.f32 %v2097_v39 }
 0x38f   :  { %v3018_v47 = vpop.eup %3017 }
 0x390   :  { %v3020_v49 = vpop.eup %3019  ;;  %v2213_v50 = vxor.u32 2147483648, %v3018_v47 }
 0x391   :  { %v2210_v51 = vxor.u32 2147483648, %v3020_v49 }
 0x392   :  { %v2214_v52 = vsel %vm2212_vm15, %v2213_v50, %v3020_v49 }
 0x393   :  { %v2211_v46 = vsel %vm2209_vm0, %v3018_v47, %v2210_v51 }
 0x394   :  { %v2215_v56 = vsel %vm2208_vm1, %v2211_v46, %v2214_v52 }
 0x395   :  { %v2216_v57 = vsel %vm2205_vm2, nan, %v2215_v56 }
 0x396   :  { %v2256_v59 = vand.u32 4294901760, %v2216_v57 }
 0x397   :  { %v3022_v3 = vpop.eup %3021 }
 0x398   :  { %2924 = vmatpush3.msra.mxu0 %v2256_v59  ;;  %v2334_v1 = vsub.f32 %v2216_v57, %v2256_v59  ;;  %v3024_v5 = vpop.eup %3023  ;;  %v2109_v2 = vxor.u32 2147483648, %v3022_v3 }
 0x399   :  { %2925 = vmatprep.subr.mxu0 %v3054_v44  ;;  %v2106_v18 = vxor.u32 2147483648, %v3024_v5 }
 0x39a   :  { %v2335_v13 = vand.u32 4294901760, %v2334_v1  ;;  %v2110_v22 = vsel %vm2108_vm3, %v2109_v2, %v3024_v5 }
 0x39b   :  { %v2107_v8 = vsel %vm2105_vm4, %v3022_v3, %v2106_v18 }
 0x39c   :  { %v2336_v12 = vsub.f32 %v2334_v1, %v2335_v13  ;;  %v2111_v4 = vsel %vm2104_vm5, %v2107_v8, %v2110_v22 }
 0x39d   :  { %v2112_v58 = vsel %vm2101_vm6, nan, %v2111_v4 }
 0x39e   :  { %v2337_v26 = vand.u32 4294901760, %v2336_v12  ;;  %v2259_v31 = vand.u32 4294901760, %v2112_v58 }
 0x3a0   :  { %2931 = vmatpush3.msra.mxu1 %v2337_v26  ;;  %2926 = vmatpush3.msra.mxu0 %v2259_v31  ;;  %v2341_v33 = vsub.f32 %v2112_v58, %v2259_v31 }
 0x3a1   :  { %2932 = vmatprep.subr.mxu1 %v3054_v44  ;;  %2928 = vmatmul.mubr.f32.vlgmr.msra.gmra.mxu0 %v2298_v27 }
 0x3a2   :  { %2937 = vmatprep.subr.mxu0 %v3054_v44  ;;  %2941 = vmatprep.mubr.msk.f32.mxu0 %vm3055_vm10, %v3054_v44  ;;  %v2342_v62 = vand.u32 4294901760, %v2341_v33 }
 0x3a3   :  { %2938 = vmatpush3.msra.mxu0 %v2334_v1 }
 0x3a4   :  { %2939 = vmatprep.subr.mxu0 %v3054_v44  ;;  %v2343_v17 = vsub.f32 %v2341_v33, %v2342_v62 }
 0x3a5   :  { %2940 = vmatpush3.msra.mxu0 %v2341_v33 }
 0x3a6   :  { %2951 = vmatprep.subr.mxu0 %v3054_v44  ;;  %2942 = vmatmul.mubr.f32.vlgmr.msra.gmra.mxu0 %v2295_v55  ;;  %v2344_v0 = vand.u32 4294901760, %v2343_v17 }
 0x3a7   :  { %2952 = vmatpush3.msra.mxu0 %v2335_v13  ;;  %2955 = vmatprep.mubr.msk.f32.mxu0 %vm3055_vm10, %v3054_v44 }
 0x3a8   :  { %2953 = vmatprep.subr.mxu0 %v3054_v44  ;;  %2933 = vmatpush3.msra.mxu1 %v2344_v0 }
 0x3a9   :  { %2954 = vmatpush3.msra.mxu0 %v2342_v62  ;;  %2935 = vmatmul.mubr.f32.vlgmr.msra.gmra.mxu1 %v3462_v48 }
 0x3aa   :  { %2944 = vmatprep.subr.mxu1 %v3054_v44  ;;  %2948 = vmatprep.mubr.msk.f32.mxu1 %vm3055_vm10, %v3054_v44 }
 0x3ab   :  { %2945 = vmatpush3.msra.mxu1 %v2256_v59  ;;  %2956 = vmatmul.mubr.f32.vlgmr.msra.gmra.mxu0 %v3462_v48 }
 0x3ac   :  { %2946 = vmatprep.subr.mxu1 %v3054_v44 }
 0x3ad   :  { %2947 = vmatpush3.msra.mxu1 %v2259_v31 }
 0x3ae   :  { %2949 = vmatmul.mubr.f32.vlgmr.msra.gmra.mxu1 %v2296_v61  ;;  %2958 = vmatprep.subr.mxu1 %v3054_v44 }
 0x3af   :  { %2959 = vmatpush3.msra.mxu1 %v2256_v59  ;;  %2962 = vmatprep.mubr.msk.f32.mxu1 %vm3055_vm10, %v3054_v44 }
 0x3b0   :  { %2960 = vmatprep.subr.mxu1 %v3054_v44 }
 0x3b1   :  { %2961 = vmatpush3.msra.mxu1 %v2259_v31 }
 0x3b2   :  { %2963 = vmatmul.mubr.f32.vlgmr.msra.gmra.mxu1 %v3462_v48 }
 0x461   :  { %v2300_v34 = vpop.f32.mrf.mxu0 }
 0x462   :  { %v2301_v36 = vadd.f32 %v2300_v34, %v2222_v15 }
 0x463   :  { %v2929_v19 = vpop.f32.mrf.mxu0 }
 0x466   :  { %v2457_v6 = vpop.f32.mrf.mxu0 }
 0x468   :  { %v2943_v21 = vpop.f32.mrf.mxu0 }
 0x469   :  { %v2381_v37 = vpop.f32.mrf.mxu1 }
 0x46a   :  { %v2382_v23 = vadd.f32 %v2381_v37, %v2301_v36 }
 0x46b   :  { %v2936_v7 = vpop.f32.mrf.mxu1  ;;  %v2609_v25 = vpop.f32.mrf.mxu0 }
 0x46c   :  { %v2458_v63 = vadd.f32 %v2457_v6, %v2382_v23 }
 0x46d   :  { %v2957_v38 = vpop.f32.mrf.mxu0 }
 0x46e   :  { %v2532_v35 = vpop.f32.mrf.mxu1 }
 0x46f   :  { %v2533_v14 = vadd.f32 %v2532_v35, %v2458_v63 }
 0x470   :  { %v2950_v29 = vpop.f32.mrf.mxu1 }
 0x471   :  { %v2610_v44 = vadd.f32 %v2609_v25, %v2533_v14 }
 0x472   :  { %v2682_v28 = vpop.f32.mrf.mxu1 }
 0x473   :  { %v2683_v9 = vadd.f32 %v2682_v28, %v2610_v44 }
 0x474   :  { %v2964_v10 = vpop.f32.mrf.mxu1 }
 0x475   :  { %2686 = vst [vmem:[#allocation2] sm:$0x1] %v2683_v9 }
 0x476   :  { %3036 = shalt.err (!%p3033_p4)
}
 0x477   :  { %2696 = dma.vmem_to_hbm [thread:$0]  %s2694_s10, 16, %s3502_s9, [#allocation3]  }
 0x478   :  { %3045 = dma.done.wait [#allocation3], 16  }
 0x479   :  { %3046 = vsyncadd [#allocation3], 4294967280 }
 0x47a   :  { %2700 = vsyncpa [#allocation3], 1 }

</bundles_post_ra>
